<compile_context>
chip_gen: v5e
topology: v5e:2x2
jax: 0.10.0
libtpu: 0.0.40
codegen_flags: <defaults>
</compile_context>

<pallas_src>
import functools

import jax
import jax.numpy as jnp
import numpy as np
from jax import lax
from jax.experimental import pallas as pl
from jax.experimental.pallas import tpu as pltpu


def _round_up(x, m):
    return (x + m - 1) // m * m


def _conv3d_relu_kernel(x_ref, w_ref, b_ref, o_ref, col_ref, *,
                        KD, KH, KW, Hp, Wp, Cin_pad, n_cols):
    """Fused im2col + single matmul + bias + ReLU for one batch element.

    x_ref:   (1, Cin_pad, s_src)           flattened zero-padded input
    w_ref:   (Cout, KD*KH*KW*Cin_pad)      packed weight slab
    b_ref:   (Cout, 1)                     bias (broadcast over lanes)
    o_ref:   (1, Cout, n_cols)             lane-dense transposed output
    col_ref: (KD*KH*KW*Cin_pad, n_cols)    VMEM scratch (im2col matrix)
    """
    # Build the im2col matrix: the row group for tap (kd, kh, kw) is the input
    # shifted by that tap's flat offset.  Static lane-offset loads and
    # tile-aligned sublane stores -- no per-tap gather/reshape relayouts.
    tap = 0
    for kd in range(KD):
        for kh in range(KH):
            for kw in range(KW):
                off = kd * Hp * Wp + kh * Wp + kw
                col_ref[pl.ds(tap * Cin_pad, Cin_pad), :] = (
                    x_ref[0, :, pl.ds(off, n_cols)])
                tap += 1

    # One MXU matmul: (Cout, K_tot) @ (K_tot, n_cols), f32 accumulation.
    acc = jnp.dot(w_ref[...], col_ref[...],
                  preferred_element_type=jnp.float32)
    acc = acc + b_ref[...]                     # (Cout, 1) broadcasts over lanes
    o_ref[0] = jnp.maximum(acc, 0.0)           # ReLU, lane-dense store


def basic_conv3d_forward(x_ncdhw, weight_oidhw, bias, *, padding=1, stride=1):
    """Conv3d(stride=1, padding=padding) + ReLU, PyTorch NCDHW/OIDHW layout."""
    assert stride == 1, "kernel assumes stride=1 (matches this module instance)"
    N, Cin, D, H, W = x_ncdhw.shape
    Cout, Cin_w, KD, KH, KW = weight_oidhw.shape
    assert Cin == Cin_w

    p = padding
    Dp, Hp, Wp = D + 2 * p, H + 2 * p, W + 2 * p
    D_out, H_out, W_out = Dp - KD + 1, Hp - KH + 1, Wp - KW + 1

    S = Dp * Hp * Wp                              # flattened padded volume
    Cin_pad = _round_up(Cin, 8)                   # sublane-aligned channels
    K_tot = KD * KH * KW * Cin_pad                # matmul contraction dim
    max_off = (KD - 1) * Hp * Wp + (KH - 1) * Wp + (KW - 1)
    # lane-aligned #columns covering every valid flat output index
    n_cols = _round_up((D_out - 1) * Hp * Wp + (H_out - 1) * Wp + W_out, 128)
    s_src = _round_up(max_off + n_cols, 128)      # padded flat source length

    # --- plain-JAX glue: pad channels+spatial, flatten, pack weight slab ----
    x = x_ncdhw.astype(jnp.float32)
    x = jnp.pad(x, ((0, 0), (0, Cin_pad - Cin), (p, p), (p, p), (p, p)))
    x_flat = x.reshape(N, Cin_pad, S)
    x_flat = jnp.pad(x_flat, ((0, 0), (0, 0), (0, s_src - S)))

    w = weight_oidhw.astype(jnp.float32)
    w = jnp.pad(w, ((0, 0), (0, Cin_pad - Cin), (0, 0), (0, 0), (0, 0)))
    # column order must match im2col rows: (kd, kh, kw) outer, cin inner
    w_flat = jnp.transpose(w, (0, 2, 3, 4, 1)).reshape(Cout, K_tot)
    b = bias.astype(jnp.float32).reshape(Cout, 1)

    kernel = functools.partial(
        _conv3d_relu_kernel,
        KD=KD, KH=KH, KW=KW, Hp=Hp, Wp=Wp, Cin_pad=Cin_pad, n_cols=n_cols)

    flops = 2 * N * Cout * Cin * KD * KH * KW * D_out * H_out * W_out
    bytes_accessed = 4 * (x_flat.size + w_flat.size + b.size + N * Cout * n_cols)

    out_cols = pl.pallas_call(
        kernel,
        out_shape=jax.ShapeDtypeStruct((N, Cout, n_cols), jnp.float32),
        grid_spec=pltpu.PrefetchScalarGridSpec(
            num_scalar_prefetch=0,
            grid=(N,),
            in_specs=[
                pl.BlockSpec((1, Cin_pad, s_src), lambda n: (n, 0, 0)),
                pl.BlockSpec((Cout, K_tot), lambda n: (0, 0)),
                pl.BlockSpec((Cout, 1), lambda n: (0, 0)),
            ],
            out_specs=pl.BlockSpec((1, Cout, n_cols), lambda n: (n, 0, 0)),
            scratch_shapes=[pltpu.VMEM((K_tot, n_cols), jnp.float32)],
        ),
        compiler_params=pltpu.CompilerParams(
            dimension_semantics=("parallel",)),
        cost_estimate=pl.CostEstimate(
            flops=flops, transcendentals=0, bytes_accessed=bytes_accessed),
    )(x_flat, w_flat, b)

    # dropout=0.0 -> identity (see TODO above).

    # Select valid columns: flat padded-domain index d*Hp*Wp + h*Wp + w with
    # d < D_out, h < H_out, w < W_out.  Output is already NCDHW, no transpose.
    if n_cols < S:
        out_cols = jnp.pad(out_cols, ((0, 0), (0, 0), (0, S - n_cols)))
    else:
        out_cols = out_cols[:, :, :S]
    out = out_cols.reshape(N, Cout, Dp, Hp, Wp)[:, :, :D_out, :H_out, :W_out]
    return out


def _reference_forward(x_ncdhw, weight_oidhw, bias, *, padding=1):
    y = lax.conv_general_dilated(
        x_ncdhw.astype(jnp.float32), weight_oidhw.astype(jnp.float32),
        window_strides=(1, 1, 1),
        padding=[(padding, padding)] * 3,
        dimension_numbers=("NCDHW", "OIDHW", "NCDHW"))
    y = y + bias.reshape(1, -1, 1, 1, 1)
    return jnp.maximum(y, 0.0)


if __name__ == "__main__":
    key = jax.random.PRNGKey(0)
    k_x, k_w, k_b = jax.random.split(key, 3)

    N, Cin, D, H, W = 2, 4, 8, 8, 8
    Cout, K = 8, 3

    x = jax.random.normal(k_x, (N, Cin, D, H, W), dtype=jnp.float32)
    # Deterministic parameter init (kaiming-ish scale, like nn.Conv3d default).
    fan_in = Cin * K * K * K
    weight = jax.random.normal(k_w, (Cout, Cin, K, K, K),
                               dtype=jnp.float32) / np.sqrt(fan_in)
    bias = jax.random.normal(k_b, (Cout,), dtype=jnp.float32) * 0.1

    fwd = jax.jit(functools.partial(basic_conv3d_forward, padding=1, stride=1))
    out = jax.block_until_ready(fwd(x, weight, bias))

    ref = jax.block_until_ready(_reference_forward(x, weight, bias, padding=1))
    np.testing.assert_allclose(np.asarray(out), np.asarray(ref),
                               atol=1e-4, rtol=1e-4)

    print("KERNEL_OK")
</pallas_src>

<mosaic_0001>
module attributes {stable_mosaic.version = 11 : i64} {
  func.func @_conv3d_relu_kernel(%arg0: i32, %arg1: memref<1x8x1152xf32, #tpu.memory_space<vmem>>, %arg2: memref<8x216xf32, #tpu.memory_space<vmem>>, %arg3: memref<8x1xf32, #tpu.memory_space<vmem>>, %arg4: memref<1x8x896xf32, #tpu.memory_space<vmem>>, %arg5: memref<216x896xf32, #tpu.memory_space<vmem>>) attributes {dimension_semantics = [#tpu.dimension_semantics<parallel>], iteration_bounds = array<i64: 2>, scalar_prefetch = 0 : i64, scratch_operands = 1 : i64, tpu.core_type = #tpu.core_type<tc>, window_params = [{transform_indices = @transform_0, window_bounds = array<i64: 1, 8, 1152>}, {pipeline_mode = #tpu.pipeline_mode<synchronous>, transform_indices = @transform_1, window_bounds = array<i64: 8, 216>}, {pipeline_mode = #tpu.pipeline_mode<synchronous>, transform_indices = @transform_2, window_bounds = array<i64: 8, 1>}, {transform_indices = @transform_3, window_bounds = array<i64: 1, 8, 896>}]} {
    %c0 = arith.constant 0 : index
    %c0_0 = arith.constant 0 : index
    %c0_1 = arith.constant 0 : index
    %0 = vector.load %arg1[%c0, %c0_0, %c0_1] : memref<1x8x1152xf32, #tpu.memory_space<vmem>>, vector<1x8x896xf32>
    %1 = vector.shape_cast %0 : vector<1x8x896xf32> to vector<8x896xf32>
    %c0_2 = arith.constant 0 : index
    %c0_3 = arith.constant 0 : index
    %2 = vector.load %arg5[%c0_2, %c0_3] : memref<216x896xf32, #tpu.memory_space<vmem>>, vector<8x896xf32>
    tpu.vector_store %arg5[%c0_2, %c0_3], %1 {strides = array<i32>} : memref<216x896xf32, #tpu.memory_space<vmem>>, vector<8x896xf32>,
    %c0_4 = arith.constant 0 : index
    %c0_5 = arith.constant 0 : index
    %c1 = arith.constant 1 : index
    %3 = vector.load %arg1[%c0_4, %c0_5, %c1] : memref<1x8x1152xf32, #tpu.memory_space<vmem>>, vector<1x8x896xf32>
    %4 = vector.shape_cast %3 : vector<1x8x896xf32> to vector<8x896xf32>
    %c8 = arith.constant 8 : index
    %c0_6 = arith.constant 0 : index
    %5 = vector.load %arg5[%c8, %c0_6] : memref<216x896xf32, #tpu.memory_space<vmem>>, vector<8x896xf32>
    tpu.vector_store %arg5[%c8, %c0_6], %4 {strides = array<i32>} : memref<216x896xf32, #tpu.memory_space<vmem>>, vector<8x896xf32>,
    %c0_7 = arith.constant 0 : index
    %c0_8 = arith.constant 0 : index
    %c2 = arith.constant 2 : index
    %6 = vector.load %arg1[%c0_7, %c0_8, %c2] : memref<1x8x1152xf32, #tpu.memory_space<vmem>>, vector<1x8x896xf32>
    %7 = vector.shape_cast %6 : vector<1x8x896xf32> to vector<8x896xf32>
    %c16 = arith.constant 16 : index
    %c0_9 = arith.constant 0 : index
    %8 = vector.load %arg5[%c16, %c0_9] : memref<216x896xf32, #tpu.memory_space<vmem>>, vector<8x896xf32>
    tpu.vector_store %arg5[%c16, %c0_9], %7 {strides = array<i32>} : memref<216x896xf32, #tpu.memory_space<vmem>>, vector<8x896xf32>,
    %c0_10 = arith.constant 0 : index
    %c0_11 = arith.constant 0 : index
    %c10 = arith.constant 10 : index
    %9 = vector.load %arg1[%c0_10, %c0_11, %c10] : memref<1x8x1152xf32, #tpu.memory_space<vmem>>, vector<1x8x896xf32>
    %10 = vector.shape_cast %9 : vector<1x8x896xf32> to vector<8x896xf32>
    %c24 = arith.constant 24 : index
    %c0_12 = arith.constant 0 : index
    %11 = vector.load %arg5[%c24, %c0_12] : memref<216x896xf32, #tpu.memory_space<vmem>>, vector<8x896xf32>
    tpu.vector_store %arg5[%c24, %c0_12], %10 {strides = array<i32>} : memref<216x896xf32, #tpu.memory_space<vmem>>, vector<8x896xf32>,
    %c0_13 = arith.constant 0 : index
    %c0_14 = arith.constant 0 : index
    %c11 = arith.constant 11 : index
    %12 = vector.load %arg1[%c0_13, %c0_14, %c11] : memref<1x8x1152xf32, #tpu.memory_space<vmem>>, vector<1x8x896xf32>
    %13 = vector.shape_cast %12 : vector<1x8x896xf32> to vector<8x896xf32>
    %c32 = arith.constant 32 : index
    %c0_15 = arith.constant 0 : index
    %14 = vector.load %arg5[%c32, %c0_15] : memref<216x896xf32, #tpu.memory_space<vmem>>, vector<8x896xf32>
    tpu.vector_store %arg5[%c32, %c0_15], %13 {strides = array<i32>} : memref<216x896xf32, #tpu.memory_space<vmem>>, vector<8x896xf32>,
    %c0_16 = arith.constant 0 : index
    %c0_17 = arith.constant 0 : index
    %c12 = arith.constant 12 : index
    %15 = vector.load %arg1[%c0_16, %c0_17, %c12] : memref<1x8x1152xf32, #tpu.memory_space<vmem>>, vector<1x8x896xf32>
    %16 = vector.shape_cast %15 : vector<1x8x896xf32> to vector<8x896xf32>
    %c40 = arith.constant 40 : index
    %c0_18 = arith.constant 0 : index
    %17 = vector.load %arg5[%c40, %c0_18] : memref<216x896xf32, #tpu.memory_space<vmem>>, vector<8x896xf32>
    tpu.vector_store %arg5[%c40, %c0_18], %16 {strides = array<i32>} : memref<216x896xf32, #tpu.memory_space<vmem>>, vector<8x896xf32>,
    %c0_19 = arith.constant 0 : index
    %c0_20 = arith.constant 0 : index
    %c20 = arith.constant 20 : index
    %18 = vector.load %arg1[%c0_19, %c0_20, %c20] : memref<1x8x1152xf32, #tpu.memory_space<vmem>>, vector<1x8x896xf32>
    %19 = vector.shape_cast %18 : vector<1x8x896xf32> to vector<8x896xf32>
    %c48 = arith.constant 48 : index
    %c0_21 = arith.constant 0 : index
    %20 = vector.load %arg5[%c48, %c0_21] : memref<216x896xf32, #tpu.memory_space<vmem>>, vector<8x896xf32>
    tpu.vector_store %arg5[%c48, %c0_21], %19 {strides = array<i32>} : memref<216x896xf32, #tpu.memory_space<vmem>>, vector<8x896xf32>,
    %c0_22 = arith.constant 0 : index
    %c0_23 = arith.constant 0 : index
    %c21 = arith.constant 21 : index
    %21 = vector.load %arg1[%c0_22, %c0_23, %c21] : memref<1x8x1152xf32, #tpu.memory_space<vmem>>, vector<1x8x896xf32>
    %22 = vector.shape_cast %21 : vector<1x8x896xf32> to vector<8x896xf32>
    %c56 = arith.constant 56 : index
    %c0_24 = arith.constant 0 : index
    %23 = vector.load %arg5[%c56, %c0_24] : memref<216x896xf32, #tpu.memory_space<vmem>>, vector<8x896xf32>
    tpu.vector_store %arg5[%c56, %c0_24], %22 {strides = array<i32>} : memref<216x896xf32, #tpu.memory_space<vmem>>, vector<8x896xf32>,
    %c0_25 = arith.constant 0 : index
    %c0_26 = arith.constant 0 : index
    %c22 = arith.constant 22 : index
    %24 = vector.load %arg1[%c0_25, %c0_26, %c22] : memref<1x8x1152xf32, #tpu.memory_space<vmem>>, vector<1x8x896xf32>
    %25 = vector.shape_cast %24 : vector<1x8x896xf32> to vector<8x896xf32>
    %c64 = arith.constant 64 : index
    %c0_27 = arith.constant 0 : index
    %26 = vector.load %arg5[%c64, %c0_27] : memref<216x896xf32, #tpu.memory_space<vmem>>, vector<8x896xf32>
    tpu.vector_store %arg5[%c64, %c0_27], %25 {strides = array<i32>} : memref<216x896xf32, #tpu.memory_space<vmem>>, vector<8x896xf32>,
    %c0_28 = arith.constant 0 : index
    %c0_29 = arith.constant 0 : index
    %c100 = arith.constant 100 : index
    %27 = vector.load %arg1[%c0_28, %c0_29, %c100] : memref<1x8x1152xf32, #tpu.memory_space<vmem>>, vector<1x8x896xf32>
    %28 = vector.shape_cast %27 : vector<1x8x896xf32> to vector<8x896xf32>
    %c72 = arith.constant 72 : index
    %c0_30 = arith.constant 0 : index
    %29 = vector.load %arg5[%c72, %c0_30] : memref<216x896xf32, #tpu.memory_space<vmem>>, vector<8x896xf32>
    tpu.vector_store %arg5[%c72, %c0_30], %28 {strides = array<i32>} : memref<216x896xf32, #tpu.memory_space<vmem>>, vector<8x896xf32>,
    %c0_31 = arith.constant 0 : index
    %c0_32 = arith.constant 0 : index
    %c101 = arith.constant 101 : index
    %30 = vector.load %arg1[%c0_31, %c0_32, %c101] : memref<1x8x1152xf32, #tpu.memory_space<vmem>>, vector<1x8x896xf32>
    %31 = vector.shape_cast %30 : vector<1x8x896xf32> to vector<8x896xf32>
    %c80 = arith.constant 80 : index
    %c0_33 = arith.constant 0 : index
    %32 = vector.load %arg5[%c80, %c0_33] : memref<216x896xf32, #tpu.memory_space<vmem>>, vector<8x896xf32>
    tpu.vector_store %arg5[%c80, %c0_33], %31 {strides = array<i32>} : memref<216x896xf32, #tpu.memory_space<vmem>>, vector<8x896xf32>,
    %c0_34 = arith.constant 0 : index
    %c0_35 = arith.constant 0 : index
    %c102 = arith.constant 102 : index
    %33 = vector.load %arg1[%c0_34, %c0_35, %c102] : memref<1x8x1152xf32, #tpu.memory_space<vmem>>, vector<1x8x896xf32>
    %34 = vector.shape_cast %33 : vector<1x8x896xf32> to vector<8x896xf32>
    %c88 = arith.constant 88 : index
    %c0_36 = arith.constant 0 : index
    %35 = vector.load %arg5[%c88, %c0_36] : memref<216x896xf32, #tpu.memory_space<vmem>>, vector<8x896xf32>
    tpu.vector_store %arg5[%c88, %c0_36], %34 {strides = array<i32>} : memref<216x896xf32, #tpu.memory_space<vmem>>, vector<8x896xf32>,
    %c0_37 = arith.constant 0 : index
    %c0_38 = arith.constant 0 : index
    %c110 = arith.constant 110 : index
    %36 = vector.load %arg1[%c0_37, %c0_38, %c110] : memref<1x8x1152xf32, #tpu.memory_space<vmem>>, vector<1x8x896xf32>
    %37 = vector.shape_cast %36 : vector<1x8x896xf32> to vector<8x896xf32>
    %c96 = arith.constant 96 : index
    %c0_39 = arith.constant 0 : index
    %38 = vector.load %arg5[%c96, %c0_39] : memref<216x896xf32, #tpu.memory_space<vmem>>, vector<8x896xf32>
    tpu.vector_store %arg5[%c96, %c0_39], %37 {strides = array<i32>} : memref<216x896xf32, #tpu.memory_space<vmem>>, vector<8x896xf32>,
    %c0_40 = arith.constant 0 : index
    %c0_41 = arith.constant 0 : index
    %c111 = arith.constant 111 : index
    %39 = vector.load %arg1[%c0_40, %c0_41, %c111] : memref<1x8x1152xf32, #tpu.memory_space<vmem>>, vector<1x8x896xf32>
    %40 = vector.shape_cast %39 : vector<1x8x896xf32> to vector<8x896xf32>
    %c104 = arith.constant 104 : index
    %c0_42 = arith.constant 0 : index
    %41 = vector.load %arg5[%c104, %c0_42] : memref<216x896xf32, #tpu.memory_space<vmem>>, vector<8x896xf32>
    tpu.vector_store %arg5[%c104, %c0_42], %40 {strides = array<i32>} : memref<216x896xf32, #tpu.memory_space<vmem>>, vector<8x896xf32>,
    %c0_43 = arith.constant 0 : index
    %c0_44 = arith.constant 0 : index
    %c112 = arith.constant 112 : index
    %42 = vector.load %arg1[%c0_43, %c0_44, %c112] : memref<1x8x1152xf32, #tpu.memory_space<vmem>>, vector<1x8x896xf32>
    %43 = vector.shape_cast %42 : vector<1x8x896xf32> to vector<8x896xf32>
    %c112_45 = arith.constant 112 : index
    %c0_46 = arith.constant 0 : index
    %44 = vector.load %arg5[%c112_45, %c0_46] : memref<216x896xf32, #tpu.memory_space<vmem>>, vector<8x896xf32>
    tpu.vector_store %arg5[%c112_45, %c0_46], %43 {strides = array<i32>} : memref<216x896xf32, #tpu.memory_space<vmem>>, vector<8x896xf32>,
    %c0_47 = arith.constant 0 : index
    %c0_48 = arith.constant 0 : index
    %c120 = arith.constant 120 : index
    %45 = vector.load %arg1[%c0_47, %c0_48, %c120] : memref<1x8x1152xf32, #tpu.memory_space<vmem>>, vector<1x8x896xf32>
    %46 = vector.shape_cast %45 : vector<1x8x896xf32> to vector<8x896xf32>
    %c120_49 = arith.constant 120 : index
    %c0_50 = arith.constant 0 : index
    %47 = vector.load %arg5[%c120_49, %c0_50] : memref<216x896xf32, #tpu.memory_space<vmem>>, vector<8x896xf32>
    tpu.vector_store %arg5[%c120_49, %c0_50], %46 {strides = array<i32>} : memref<216x896xf32, #tpu.memory_space<vmem>>, vector<8x896xf32>,
    %c0_51 = arith.constant 0 : index
    %c0_52 = arith.constant 0 : index
    %c121 = arith.constant 121 : index
    %48 = vector.load %arg1[%c0_51, %c0_52, %c121] : memref<1x8x1152xf32, #tpu.memory_space<vmem>>, vector<1x8x896xf32>
    %49 = vector.shape_cast %48 : vector<1x8x896xf32> to vector<8x896xf32>
    %c128 = arith.constant 128 : index
    %c0_53 = arith.constant 0 : index
    %50 = vector.load %arg5[%c128, %c0_53] : memref<216x896xf32, #tpu.memory_space<vmem>>, vector<8x896xf32>
    tpu.vector_store %arg5[%c128, %c0_53], %49 {strides = array<i32>} : memref<216x896xf32, #tpu.memory_space<vmem>>, vector<8x896xf32>,
    %c0_54 = arith.constant 0 : index
    %c0_55 = arith.constant 0 : index
    %c122 = arith.constant 122 : index
    %51 = vector.load %arg1[%c0_54, %c0_55, %c122] : memref<1x8x1152xf32, #tpu.memory_space<vmem>>, vector<1x8x896xf32>
    %52 = vector.shape_cast %51 : vector<1x8x896xf32> to vector<8x896xf32>
    %c136 = arith.constant 136 : index
    %c0_56 = arith.constant 0 : index
    %53 = vector.load %arg5[%c136, %c0_56] : memref<216x896xf32, #tpu.memory_space<vmem>>, vector<8x896xf32>
    tpu.vector_store %arg5[%c136, %c0_56], %52 {strides = array<i32>} : memref<216x896xf32, #tpu.memory_space<vmem>>, vector<8x896xf32>,
    %c0_57 = arith.constant 0 : index
    %c0_58 = arith.constant 0 : index
    %c200 = arith.constant 200 : index
    %54 = vector.load %arg1[%c0_57, %c0_58, %c200] : memref<1x8x1152xf32, #tpu.memory_space<vmem>>, vector<1x8x896xf32>
    %55 = vector.shape_cast %54 : vector<1x8x896xf32> to vector<8x896xf32>
    %c144 = arith.constant 144 : index
    %c0_59 = arith.constant 0 : index
    %56 = vector.load %arg5[%c144, %c0_59] : memref<216x896xf32, #tpu.memory_space<vmem>>, vector<8x896xf32>
    tpu.vector_store %arg5[%c144, %c0_59], %55 {strides = array<i32>} : memref<216x896xf32, #tpu.memory_space<vmem>>, vector<8x896xf32>,
    %c0_60 = arith.constant 0 : index
    %c0_61 = arith.constant 0 : index
    %c201 = arith.constant 201 : index
    %57 = vector.load %arg1[%c0_60, %c0_61, %c201] : memref<1x8x1152xf32, #tpu.memory_space<vmem>>, vector<1x8x896xf32>
    %58 = vector.shape_cast %57 : vector<1x8x896xf32> to vector<8x896xf32>
    %c152 = arith.constant 152 : index
    %c0_62 = arith.constant 0 : index
    %59 = vector.load %arg5[%c152, %c0_62] : memref<216x896xf32, #tpu.memory_space<vmem>>, vector<8x896xf32>
    tpu.vector_store %arg5[%c152, %c0_62], %58 {strides = array<i32>} : memref<216x896xf32, #tpu.memory_space<vmem>>, vector<8x896xf32>,
    %c0_63 = arith.constant 0 : index
    %c0_64 = arith.constant 0 : index
    %c202 = arith.constant 202 : index
    %60 = vector.load %arg1[%c0_63, %c0_64, %c202] : memref<1x8x1152xf32, #tpu.memory_space<vmem>>, vector<1x8x896xf32>
    %61 = vector.shape_cast %60 : vector<1x8x896xf32> to vector<8x896xf32>
    %c160 = arith.constant 160 : index
    %c0_65 = arith.constant 0 : index
    %62 = vector.load %arg5[%c160, %c0_65] : memref<216x896xf32, #tpu.memory_space<vmem>>, vector<8x896xf32>
    tpu.vector_store %arg5[%c160, %c0_65], %61 {strides = array<i32>} : memref<216x896xf32, #tpu.memory_space<vmem>>, vector<8x896xf32>,
    %c0_66 = arith.constant 0 : index
    %c0_67 = arith.constant 0 : index
    %c210 = arith.constant 210 : index
    %63 = vector.load %arg1[%c0_66, %c0_67, %c210] : memref<1x8x1152xf32, #tpu.memory_space<vmem>>, vector<1x8x896xf32>
    %64 = vector.shape_cast %63 : vector<1x8x896xf32> to vector<8x896xf32>
    %c168 = arith.constant 168 : index
    %c0_68 = arith.constant 0 : index
    %65 = vector.load %arg5[%c168, %c0_68] : memref<216x896xf32, #tpu.memory_space<vmem>>, vector<8x896xf32>
    tpu.vector_store %arg5[%c168, %c0_68], %64 {strides = array<i32>} : memref<216x896xf32, #tpu.memory_space<vmem>>, vector<8x896xf32>,
    %c0_69 = arith.constant 0 : index
    %c0_70 = arith.constant 0 : index
    %c211 = arith.constant 211 : index
    %66 = vector.load %arg1[%c0_69, %c0_70, %c211] : memref<1x8x1152xf32, #tpu.memory_space<vmem>>, vector<1x8x896xf32>
    %67 = vector.shape_cast %66 : vector<1x8x896xf32> to vector<8x896xf32>
    %c176 = arith.constant 176 : index
    %c0_71 = arith.constant 0 : index
    %68 = vector.load %arg5[%c176, %c0_71] : memref<216x896xf32, #tpu.memory_space<vmem>>, vector<8x896xf32>
    tpu.vector_store %arg5[%c176, %c0_71], %67 {strides = array<i32>} : memref<216x896xf32, #tpu.memory_space<vmem>>, vector<8x896xf32>,
    %c0_72 = arith.constant 0 : index
    %c0_73 = arith.constant 0 : index
    %c212 = arith.constant 212 : index
    %69 = vector.load %arg1[%c0_72, %c0_73, %c212] : memref<1x8x1152xf32, #tpu.memory_space<vmem>>, vector<1x8x896xf32>
    %70 = vector.shape_cast %69 : vector<1x8x896xf32> to vector<8x896xf32>
    %c184 = arith.constant 184 : index
    %c0_74 = arith.constant 0 : index
    %71 = vector.load %arg5[%c184, %c0_74] : memref<216x896xf32, #tpu.memory_space<vmem>>, vector<8x896xf32>
    tpu.vector_store %arg5[%c184, %c0_74], %70 {strides = array<i32>} : memref<216x896xf32, #tpu.memory_space<vmem>>, vector<8x896xf32>,
    %c0_75 = arith.constant 0 : index
    %c0_76 = arith.constant 0 : index
    %c220 = arith.constant 220 : index
    %72 = vector.load %arg1[%c0_75, %c0_76, %c220] : memref<1x8x1152xf32, #tpu.memory_space<vmem>>, vector<1x8x896xf32>
    %73 = vector.shape_cast %72 : vector<1x8x896xf32> to vector<8x896xf32>
    %c192 = arith.constant 192 : index
    %c0_77 = arith.constant 0 : index
    %74 = vector.load %arg5[%c192, %c0_77] : memref<216x896xf32, #tpu.memory_space<vmem>>, vector<8x896xf32>
    tpu.vector_store %arg5[%c192, %c0_77], %73 {strides = array<i32>} : memref<216x896xf32, #tpu.memory_space<vmem>>, vector<8x896xf32>,
    %c0_78 = arith.constant 0 : index
    %c0_79 = arith.constant 0 : index
    %c221 = arith.constant 221 : index
    %75 = vector.load %arg1[%c0_78, %c0_79, %c221] : memref<1x8x1152xf32, #tpu.memory_space<vmem>>, vector<1x8x896xf32>
    %76 = vector.shape_cast %75 : vector<1x8x896xf32> to vector<8x896xf32>
    %c200_80 = arith.constant 200 : index
    %c0_81 = arith.constant 0 : index
    %77 = vector.load %arg5[%c200_80, %c0_81] : memref<216x896xf32, #tpu.memory_space<vmem>>, vector<8x896xf32>
    tpu.vector_store %arg5[%c200_80, %c0_81], %76 {strides = array<i32>} : memref<216x896xf32, #tpu.memory_space<vmem>>, vector<8x896xf32>,
    %c0_82 = arith.constant 0 : index
    %c0_83 = arith.constant 0 : index
    %c222 = arith.constant 222 : index
    %78 = vector.load %arg1[%c0_82, %c0_83, %c222] : memref<1x8x1152xf32, #tpu.memory_space<vmem>>, vector<1x8x896xf32>
    %79 = vector.shape_cast %78 : vector<1x8x896xf32> to vector<8x896xf32>
    %c208 = arith.constant 208 : index
    %c0_84 = arith.constant 0 : index
    %80 = vector.load %arg5[%c208, %c0_84] : memref<216x896xf32, #tpu.memory_space<vmem>>, vector<8x896xf32>
    tpu.vector_store %arg5[%c208, %c0_84], %79 {strides = array<i32>} : memref<216x896xf32, #tpu.memory_space<vmem>>, vector<8x896xf32>,
    %c0_85 = arith.constant 0 : index
    %c0_86 = arith.constant 0 : index
    %81 = vector.load %arg2[%c0_85, %c0_86] : memref<8x216xf32, #tpu.memory_space<vmem>>, vector<8x216xf32>
    %c0_87 = arith.constant 0 : index
    %c0_88 = arith.constant 0 : index
    %82 = vector.load %arg5[%c0_87, %c0_88] : memref<216x896xf32, #tpu.memory_space<vmem>>, vector<216x896xf32>
    %cst = arith.constant dense<0.000000e+00> : vector<8x896xf32>
    %83 = tpu.matmul %81, %82, %cst {dimension_numbers = #tpu.dot_dimension_numbers<[1], [0], [0], [1], [0, 0, 1, 1], [], []>} : vector<8x216xf32>, vector<216x896xf32>, vector<8x896xf32> -> vector<8x896xf32>
    %c0_89 = arith.constant 0 : index
    %c0_90 = arith.constant 0 : index
    %84 = vector.load %arg3[%c0_89, %c0_90] : memref<8x1xf32, #tpu.memory_space<vmem>>, vector<8x1xf32>
    %85 = vector.broadcast %84 : vector<8x1xf32> to vector<8x896xf32>
    %86 = arith.addf %83, %85 : vector<8x896xf32>
    %cst_91 = arith.constant 0.000000e+00 : f32
    %87 = vector.broadcast %cst_91 : f32 to vector<8x896xf32>
    %88 = arith.maximumf %86, %87 : vector<8x896xf32>
    %c0_92 = arith.constant 0 : index
    %c0_93 = arith.constant 0 : index
    %c0_94 = arith.constant 0 : index
    %89 = vector.load %arg4[%c0_92, %c0_93, %c0_94] : memref<1x8x896xf32, #tpu.memory_space<vmem>>, vector<1x8x896xf32>
    %90 = vector.shape_cast %89 : vector<1x8x896xf32> to vector<8x896xf32>
    %91 = vector.shape_cast %88 : vector<8x896xf32> to vector<1x8x896xf32>
    tpu.vector_store %arg4[%c0_92, %c0_93, %c0_94], %91 {strides = array<i32>} : memref<1x8x896xf32, #tpu.memory_space<vmem>>, vector<1x8x896xf32>,
    return
  }
  func.func @transform_0(%arg0: i32) -> (i32, i32, i32) {
    %c0_i32 = arith.constant 0 : i32
    %c0_i32_0 = arith.constant 0 : i32
    %c0_i32_1 = arith.constant 0 : i32
    return %arg0, %c0_i32, %c0_i32_0 : i32, i32, i32
  }
  func.func @transform_1(%arg0: i32) -> (i32, i32) {
    %c0_i32 = arith.constant 0 : i32
    %c0_i32_0 = arith.constant 0 : i32
    %c0_i32_1 = arith.constant 0 : i32
    return %c0_i32, %c0_i32_0 : i32, i32
  }
  func.func @transform_2(%arg0: i32) -> (i32, i32) {
    %c0_i32 = arith.constant 0 : i32
    %c0_i32_0 = arith.constant 0 : i32
    %c0_i32_1 = arith.constant 0 : i32
    return %c0_i32, %c0_i32_0 : i32, i32
  }
  func.func @transform_3(%arg0: i32) -> (i32, i32, i32) {
    %c0_i32 = arith.constant 0 : i32
    %c0_i32_0 = arith.constant 0 : i32
    %c0_i32_1 = arith.constant 0 : i32
    return %arg0, %c0_i32, %c0_i32_0 : i32, i32, i32
  }
}

</mosaic_0001>

<bundles_post_ra>
// kernel: basic_conv3d_forward.1
= control target key start
LH: loop header
LB: loop body
LE: loop exit
PB: predicated region body
PF: predicated region fallthrough
CT: control target
= control target key end

     0   :  { %s2769_s12 = smov 0   ;;  %s4071_s0 = inlined_call_operand.vmem [shape: f32[2,8,1152], index: 0, kind: input, shape index: {}]   ;;  %s4072_s1 = inlined_call_operand.vmem [shape: f32[8,216], index: 1, kind: input, shape index: {}]   ;;  %s4073_s2 = inlined_call_operand.vmem [shape: f32[8,1], index: 2, kind: input, shape index: {}]   ;;  %s4074_s3 = inlined_call_operand.vmem [shape: f32[2,8,896], index: 3, kind: output, shape index: {}]  }
   0x1 LB: > { %s2139_s13 = sadd.s32 4294967295, %s2720_s12   ;;  %p2143_p0 = scmp.ge.s32.totalorder %s2720_s12, 1  ;;  %s2720_s12 = sphi %s2769_s12, %s13_s12  }
   0x2   : > { %p137_p1 = scmp.lt.s32.totalorder %s2720_s12, 3 }
   0x4   : > { %p138_p2 = pnand %p2143_p0, %p137_p1 }
   0x6   : > { %141 = sbr.rel (%p138_p2) target bundleno = 582 (0x246), region = 32 }
   0xb   : > { %p161_p3 = scmp.lt.s32.totalorder %s2139_s13, 1  ;;  %s2722_s18 = smov 126   ;;  %vm271_vm0 = vcmask 1031168   ;;  %vm325_vm1 = vcmask 965632   ;;  %vm217_vm2 = vcmask 1039360   ;;  %vm379_vm3 = vcmask 957440  }
   0xc   : > { %s2723_s19 = smov 127   ;;  %s2724_s20 = smov 118   ;;  %vm433_vm4 = vcmask 949248   ;;  %vm487_vm5 = vcmask 883712   ;;  %vm541_vm6 = vcmask 875520   ;;  %vm595_vm7 = vcmask 867328  }
   0xd   : > { %s4263_s13 = smov (!%p161_p3, %s2139_s13), 1  ;;  %s2725_s21 = smov 117   ;;  %vm649_vm8 = vcmask 228352   ;;  %vm703_vm9 = vcmask 220160   ;;  %vm757_vm10 = vcmask 211968   ;;  %vm811_vm11 = vcmask 146432  }
   0xe   : > { %s2155_s14 = smul.u32 72, %s4263_s13  ;;  %s2726_s22 = smov 116   ;;  %vm865_vm12 = vcmask 138240   ;;  %vm919_vm13 = vcmask 130048   ;;  %vm973_vm14 = vcmask 64512   ;;  %vm1027_vm15 = vcmask 56320  }
   0xf   : > { %s2727_s23 = smov 108   ;;  %s2728_s24 = smov 107  }
  0x10   : > { %s2783_s17 = scalar_lea.vmem %s4071_s0, %s2155_s14  ;;  %s2729_s25 = smov 106  }
  0x11   : > { %v239_v0 = vld [vmem:[%s2783_s17] sm:$0xff]  ;;  %v2787_v1 = vld [vmem:[%s2783_s17 + $0x8] sm:$0xff]  ;;  %v241_v6 = vld [vmem:[%s2783_s17 + $0x10] sm:$0xff]  ;;  %s2730_s26 = smov 28   ;;  %s2731_s27 = smov 27  }
  0x12   : > { %v2790_v2 = vld [vmem:[%s2783_s17 + $0x20] sm:$0xff]  ;;  %v2793_v3 = vpack.i.bf16 %v2787_v1, %v239_v0  ;;  %v2796_v4 = vld [vmem:[%s2783_s17 + $0x28] sm:$0xff]  ;;  %v242_v7 = vld [vmem:[%s2783_s17 + $0x18] sm:$0xff]  ;;  %s2732_s28 = smov 26   ;;  %s2733_s29 = smov 18  }
  0x13   : > { %v2800_v5 = vpack.i.bf16 %v2796_v4, %v2790_v2  ;;  %v2808_v8 = vld [vmem:[%s2783_s17 + $0x30] sm:$0xff]  ;;  %v192_v9 = vld [vmem:[%s2783_s17 + $0x38] sm:$0xff]  ;;  %v2811_v10 = vpack.i.bf16 %v242_v7, %v241_v6  ;;  %s2734_s30 = smov 17   ;;  %s2735_s4 = smov 16  }
  0x14   : > { %2213 = vrot.lane.b32.xlu2 %v2793_v3, %s2722_s18  ;;  %2193 = vrot.lane.b32.xlu0 %v2793_v3, %s2723_s19  ;;  %v2814_v11 = vpack.i.bf16 %v192_v9, %v2808_v8  ;;  %s2736_s5 = smov 8   ;;  %s2737_s6 = smov 7  }
  0x15   : > { %2203 = vrot.lane.b32.xlu1 %v2800_v5, %s2723_s19  ;;  %s2738_s7 = smov 6   ;;  %s2739_s8 = smov 36  }
  0x16   : > { %s2740_s9 = smov 34   ;;  %s2741_s10 = smov 35  }
  0x17   : > { %s2742_s11 = smov 44   ;;  %s2743_s14 = smov 46  }
  0x18   : > { %s2744_s15 = smov 45   ;;  %s2745_s16 = smov 54  }
  0x1c   : > { %2218 = vrot.lane.b32.xlu2 %v2811_v10, %s2722_s18  ;;  %2198 = vrot.lane.b32.xlu0 %v2811_v10, %s2723_s19 }
  0x1d   : > { %2208 = vrot.lane.b32.xlu1 %v2814_v11, %s2723_s19  ;;  %s2747_s19 = smov 55  }
  0x24   : > { %2233 = vrot.lane.b32.xlu2 %v2793_v3, %s2724_s20  ;;  %2223 = vrot.lane.b32.xlu0 %v2800_v5, %s2722_s18 }
  0x25   : > { %2228 = vrot.lane.b32.xlu1 %v2814_v11, %s2722_s18  ;;  %s2746_s18 = smov 56  }
  0x2c   : > { %2248 = vrot.lane.b32.xlu2 %v2814_v11, %s2724_s20  ;;  %2238 = vrot.lane.b32.xlu0 %v2811_v10, %s2724_s20 }
  0x2d   : > { %2243 = vrot.lane.b32.xlu1 %v2800_v5, %s2724_s20 }
  0x34   : > { %2263 = vrot.lane.b32.xlu2 %v2800_v5, %s2725_s21  ;;  %2253 = vrot.lane.b32.xlu0 %v2793_v3, %s2725_s21 }
  0x35   : > { %2258 = vrot.lane.b32.xlu1 %v2811_v10, %s2725_s21 }
  0x3c   : > { %2278 = vrot.lane.b32.xlu2 %v2811_v10, %s2726_s22  ;;  %2268 = vrot.lane.b32.xlu0 %v2814_v11, %s2725_s21 }
  0x3d   : > { %2273 = vrot.lane.b32.xlu1 %v2793_v3, %s2726_s22 }
  0x44   : > { %2293 = vrot.lane.b32.xlu2 %v2793_v3, %s2727_s23  ;;  %2283 = vrot.lane.b32.xlu0 %v2800_v5, %s2726_s22 }
  0x45   : > { %2288 = vrot.lane.b32.xlu1 %v2814_v11, %s2726_s22 }
  0x4c   : > { %2308 = vrot.lane.b32.xlu2 %v2814_v11, %s2727_s23  ;;  %2298 = vrot.lane.b32.xlu0 %v2811_v10, %s2727_s23 }
  0x4d   : > { %2303 = vrot.lane.b32.xlu1 %v2800_v5, %s2727_s23 }
  0x54   : > { %2323 = vrot.lane.b32.xlu2 %v2800_v5, %s2728_s24  ;;  %2313 = vrot.lane.b32.xlu0 %v2793_v3, %s2728_s24 }
  0x55   : > { %2318 = vrot.lane.b32.xlu1 %v2811_v10, %s2728_s24 }
  0x5c   : > { %2338 = vrot.lane.b32.xlu2 %v2811_v10, %s2729_s25  ;;  %2328 = vrot.lane.b32.xlu0 %v2814_v11, %s2728_s24 }
  0x5d   : > { %2333 = vrot.lane.b32.xlu1 %v2793_v3, %s2729_s25 }
  0x64   : > { %2353 = vrot.lane.b32.xlu2 %v2793_v3, %s2730_s26  ;;  %2343 = vrot.lane.b32.xlu0 %v2800_v5, %s2729_s25 }
  0x65   : > { %2348 = vrot.lane.b32.xlu1 %v2814_v11, %s2729_s25 }
  0x6c   : > { %2368 = vrot.lane.b32.xlu2 %v2814_v11, %s2730_s26  ;;  %2358 = vrot.lane.b32.xlu0 %v2811_v10, %s2730_s26 }
  0x6d   : > { %2363 = vrot.lane.b32.xlu1 %v2800_v5, %s2730_s26  ;;  %s2156_s26 = smul.u32 56, %s4263_s13 }
  0x6e   : > { %v2849_v12 = vpop.permute.xlu2 %2213 }
  0x6f   : > { %v4076_v13 = vunpack.i.h.bf16 %v2849_v12 }
  0x74   : > { %2383 = vrot.lane.b32.xlu2 %v2800_v5, %s2731_s27  ;;  %2373 = vrot.lane.b32.xlu0 %v2793_v3, %s2731_s27 }
  0x75   : > { %2378 = vrot.lane.b32.xlu1 %v2811_v10, %s2731_s27 }
  0x76   : > { %v2219_v14 = vpop.permute.xlu2 %2218 }
  0x77   : > { %v2221_v15 = vunpack.i.h.bf16 %v2219_v14  ;;  %v2220_v16 = vunpack.i.l.bf16 %v2219_v14 }
  0x79   : > { %v2858_v17 = vsel %vm271_vm0, %v4076_v13, %v2220_v16  ;;  %v2861_v18 = vsel %vm271_vm0, %v2220_v16, %v2221_v15 }
  0x7a   : > { %4109 = vst [vmem:[#allocation3_spill] sm:$0xff] %v2861_v18 }
  0x7c   : > { %2398 = vrot.lane.b32.xlu2 %v2811_v10, %s2732_s28  ;;  %2388 = vrot.lane.b32.xlu0 %v2814_v11, %s2731_s27 }
  0x7d   : > { %2393 = vrot.lane.b32.xlu1 %v2793_v3, %s2732_s28 }
  0x7e   : > { %v2866_v19 = vpop.permute.xlu2 %2233 }
  0x7f   : > { %v4077_v61 = vunpack.i.h.bf16 %v2866_v19 }
  0x84   : > { %2413 = vrot.lane.b32.xlu2 %v2793_v3, %s2733_s29  ;;  %2403 = vrot.lane.b32.xlu0 %v2800_v5, %s2732_s28 }
  0x85   : > { %2408 = vrot.lane.b32.xlu1 %v2814_v11, %s2732_s28 }
  0x86   : > { %v2871_v20 = vpop.permute.xlu2 %2248  ;;  %v2873_v21 = vpop.permute.xlu0 %2193 }
  0x87   : > { %v2251_v22 = vunpack.i.h.bf16 %v2871_v20  ;;  %v2250_v23 = vunpack.i.l.bf16 %v2871_v20  ;;  %v2204_v24 = vpop.permute.xlu1 %2203  ;;  %v4075_v29 = vunpack.i.h.bf16 %v2873_v21 }
  0x88   : > { %v2206_v25 = vunpack.i.h.bf16 %v2204_v24  ;;  %v2205_v26 = vunpack.i.l.bf16 %v2204_v24 }
  0x89   : > { %v2880_v27 = vsel %vm325_vm1, %v2250_v23, %v2251_v22 }
  0x8a   : > { %4110 = vst [vmem:[#allocation4_spill] sm:$0xff] %v2880_v27  ;;  %v2883_v28 = vsel %vm217_vm2, %v2205_v26, %v2206_v25 }
  0x8b   : > { %4111 = vst [vmem:[#allocation5_spill] sm:$0xff] %v2883_v28 }
  0x8c   : > { %2428 = vrot.lane.b32.xlu2 %v2814_v11, %s2733_s29  ;;  %2418 = vrot.lane.b32.xlu0 %v2811_v10, %s2733_s29 }
  0x8d   : > { %2423 = vrot.lane.b32.xlu1 %v2800_v5, %s2733_s29  ;;  %s4059_s29 = scalar_lea.vmem %s4074_s3, %s2156_s26 }
  0x8e   : > { %v2889_v30 = vpop.permute.xlu2 %2263  ;;  %v2199_v31 = vpop.permute.xlu0 %2198 }
  0x8f   : > { %v2266_v32 = vunpack.i.h.bf16 %v2889_v30  ;;  %v2265_v33 = vunpack.i.l.bf16 %v2889_v30  ;;  %v2209_v34 = vpop.permute.xlu1 %2208  ;;  %v2201_v35 = vunpack.i.h.bf16 %v2199_v31  ;;  %v2200_v36 = vunpack.i.l.bf16 %v2199_v31 }
  0x90   : > { %v2211_v37 = vunpack.i.h.bf16 %v2209_v34  ;;  %v2210_v38 = vunpack.i.l.bf16 %v2209_v34 }
  0x91   : > { %v2896_v39 = vsel %vm217_vm2, %v4075_v29, %v2200_v36  ;;  %v2899_v40 = vsel %vm217_vm2, %v2201_v35, %v2205_v26  ;;  %v2902_v41 = vsel %vm217_vm2, %v2200_v36, %v2201_v35  ;;  %v2909_v42 = vsel %vm379_vm3, %v2265_v33, %v2266_v32 }
  0x92   : > { %4112 = vst [vmem:[#allocation6_spill] sm:$0xff] %v2902_v41  ;;  %v2912_v43 = vsel %vm217_vm2, %v2206_v25, %v2210_v38  ;;  %v2915_v44 = vsel %vm217_vm2, %v2210_v38, %v2211_v37 }
  0x93   : > { %4113 = vst [vmem:[#allocation7_spill] sm:$0xff] %v2909_v42 }
  0x94   : > { %4114 = vst [vmem:[#allocation8_spill] sm:$0xff] %v2912_v43  ;;  %2443 = vrot.lane.b32.xlu2 %v2800_v5, %s2734_s30  ;;  %2433 = vrot.lane.b32.xlu0 %v2793_v3, %s2734_s30 }
  0x95   : > { %4115 = vst [vmem:[#allocation9_spill] sm:$0xff] %v2915_v44  ;;  %2438 = vrot.lane.b32.xlu1 %v2811_v10, %s2734_s30 }
  0x96   : > { %v2920_v45 = vpop.permute.xlu2 %2278  ;;  %v2224_v46 = vpop.permute.xlu0 %2223 }
  0x97   : > { %v2281_v47 = vunpack.i.h.bf16 %v2920_v45  ;;  %v2280_v48 = vunpack.i.l.bf16 %v2920_v45  ;;  %v2229_v49 = vpop.permute.xlu1 %2228  ;;  %v2226_v50 = vunpack.i.h.bf16 %v2224_v46  ;;  %v2225_v51 = vunpack.i.l.bf16 %v2224_v46 }
  0x98   : > { %v2231_v52 = vunpack.i.h.bf16 %v2229_v49  ;;  %v2230_v53 = vunpack.i.l.bf16 %v2229_v49 }
  0x99   : > { %v2925_v54 = vsel %vm271_vm0, %v2221_v15, %v2225_v51  ;;  %v2930_v55 = vsel %vm433_vm4, %v2280_v48, %v2281_v47  ;;  %v2933_v56 = vsel %vm271_vm0, %v2225_v51, %v2226_v50 }
  0x9a   : > { %4116 = vst [vmem:[#allocation10_spill] sm:$0xff] %v2930_v55  ;;  %v2936_v57 = vsel %vm271_vm0, %v2226_v50, %v2230_v53  ;;  %v2939_v58 = vsel %vm271_vm0, %v2230_v53, %v2231_v52 }
  0x9b   : > { %4117 = vst [vmem:[#allocation11_spill] sm:$0xff] %v2933_v56  ;;  %v2622_v56 = vpack.i.bf16 %v2808_v8, %v2796_v4  ;;  %v3264_v4 = vld [vmem:[%s2783_s17 + $0x28] sm:$0xff] }
  0x9c   : > { %4118 = vst [vmem:[#allocation12_spill] sm:$0xff] %v2936_v57  ;;  %2458 = vrot.lane.b32.xlu2 %v2811_v10, %s2735_s4  ;;  %2448 = vrot.lane.b32.xlu0 %v2814_v11, %s2734_s30 }
  0x9d   : > { %4119 = vst [vmem:[#allocation13_spill] sm:$0xff] %v2939_v58  ;;  %2453 = vrot.lane.b32.xlu1 %v2793_v3, %s2735_s4 }
  0x9e   : > { %v2944_v59 = vpop.permute.xlu2 %2293  ;;  %v2239_v60 = vpop.permute.xlu0 %2238 }
  0x9f   : > { %v2244_v62 = vpop.permute.xlu1 %2243  ;;  %v2241_v63 = vunpack.i.h.bf16 %v2239_v60  ;;  %v2240_v0 = vunpack.i.l.bf16 %v2239_v60 }
  0xa0   : > { %v2246_v6 = vunpack.i.h.bf16 %v2244_v62  ;;  %v2245_v7 = vunpack.i.l.bf16 %v2244_v62 }
  0xa1   : > { %v2950_v9 = vsel %vm325_vm1, %v4077_v61, %v2240_v0  ;;  %v2953_v14 = vsel %vm325_vm1, %v2240_v0, %v2241_v63 }
  0xa2   : > { %4120 = vst [vmem:[#allocation14_spill] sm:$0xff] %v2953_v14  ;;  %v2956_v15 = vsel %vm325_vm1, %v2241_v63, %v2245_v7  ;;  %v2959_v16 = vsel %vm325_vm1, %v2245_v7, %v2246_v6  ;;  %v2964_v22 = vsel %vm325_vm1, %v2246_v6, %v2250_v23 }
  0xa3   : > { %4121 = vst [vmem:[#allocation15_spill] sm:$0xff] %v2959_v16 }
  0xa4   : > { %4122 = vst [vmem:[#allocation16_spill] sm:$0xff] %v2964_v22  ;;  %2473 = vrot.lane.b32.xlu2 %v2793_v3, %s2736_s5  ;;  %2463 = vrot.lane.b32.xlu0 %v2800_v5, %s2735_s4 }
  0xa5   : > { %2468 = vrot.lane.b32.xlu1 %v2814_v11, %s2735_s4 }
  0xa6   : > { %v2969_v24 = vpop.permute.xlu2 %2308  ;;  %v2971_v25 = vpop.permute.xlu0 %2253 }
  0xa7   : > { %v2311_v26 = vunpack.i.h.bf16 %v2969_v24  ;;  %v2310_v31 = vunpack.i.l.bf16 %v2969_v24  ;;  %v2259_v34 = vpop.permute.xlu1 %2258  ;;  %v4078_v20 = vunpack.i.h.bf16 %v2971_v25 }
  0xa8   : > { %v2261_v23 = vunpack.i.h.bf16 %v2259_v34  ;;  %v2260_v35 = vunpack.i.l.bf16 %v2259_v34 }
  0xa9   : > { %v2977_v36 = vsel %vm487_vm5, %v2310_v31, %v2311_v26 }
  0xaa   : > { %4123 = vst [vmem:[#allocation17_spill] sm:$0xff] %v2977_v36  ;;  %v2982_v37 = vsel %vm379_vm3, %v4078_v20, %v2260_v35  ;;  %v2987_v38 = vsel %vm379_vm3, %v2261_v23, %v2265_v33  ;;  %v2990_v46 = vsel %vm379_vm3, %v2260_v35, %v2261_v23 }
  0xab   : > { %4124 = vst [vmem:[#allocation18_spill] sm:$0xff] %v2990_v46 }
  0xac   : > { %2488 = vrot.lane.b32.xlu2 %v2814_v11, %s2736_s5  ;;  %2478 = vrot.lane.b32.xlu0 %v2811_v10, %s2736_s5 }
  0xad   : > { %2483 = vrot.lane.b32.xlu1 %v2800_v5, %s2736_s5 }
  0xae   : > { %v2995_v49 = vpop.permute.xlu2 %2323  ;;  %v2269_v50 = vpop.permute.xlu0 %2268 }
  0xaf   : > { %v4083_v51 = vunpack.i.h.bf16 %v2995_v49  ;;  %v2325_v52 = vunpack.i.l.bf16 %v2995_v49  ;;  %v2999_v53 = vpop.permute.xlu1 %2273  ;;  %v2271_v33 = vunpack.i.h.bf16 %v2269_v50  ;;  %v2270_v60 = vunpack.i.l.bf16 %v2269_v50 }
  0xb0   : > { %v4079_v62 = vunpack.i.h.bf16 %v2999_v53  ;;  %v4138_v27 = vunpack.i.h.bf16 %v2995_v49 }
  0xb1   : > { %v3007_v63 = vsel %vm541_vm6, %v2325_v52, %v4083_v51  ;;  %v3012_v0 = vsel %vm379_vm3, %v2266_v32, %v2270_v60  ;;  %v3015_v6 = vsel %vm379_vm3, %v2270_v60, %v2271_v33 }
  0xb2   : > { %4125 = vst [vmem:[#allocation19_spill] sm:$0xff] %v3007_v63  ;;  %v3020_v7 = vsel %vm433_vm4, %v4079_v62, %v2280_v48 }
  0xb3   : > { %4126 = vst [vmem:[#allocation20_spill] sm:$0xff] %v3012_v0 }
  0xb4   : > { %4127 = vst [vmem:[#allocation21_spill] sm:$0xff] %v3015_v6  ;;  %2503 = vrot.lane.b32.xlu2 %v2800_v5, %s2737_s6  ;;  %2493 = vrot.lane.b32.xlu0 %v2793_v3, %s2737_s6 }
  0xb5   : > { %2498 = vrot.lane.b32.xlu1 %v2811_v10, %s2737_s6 }
  0xb6   : > { %v3025_v24 = vpop.permute.xlu2 %2338  ;;  %v2284_v30 = vpop.permute.xlu0 %2283 }
  0xb7   : > { %v4081_v32 = vunpack.i.h.bf16 %v3025_v24  ;;  %v4082_v26 = vunpack.i.l.bf16 %v3025_v24  ;;  %v2289_v34 = vpop.permute.xlu1 %2288  ;;  %v2286_v23 = vunpack.i.h.bf16 %v2284_v30  ;;  %v2285_v35 = vunpack.i.l.bf16 %v2284_v30 }
  0xb8   : > { %v2291_v50 = vunpack.i.h.bf16 %v2289_v34  ;;  %v2290_v48 = vunpack.i.l.bf16 %v2289_v34  ;;  %v4141_v36 = vunpack.i.l.bf16 %v3025_v24  ;;  %v4142_v43 = vunpack.i.h.bf16 %v3025_v24 }
  0xb9   : > { %v3032_v5 = vsel %vm433_vm4, %v2281_v47, %v2285_v35  ;;  %v3039_v33 = vsel %vm595_vm7, %v4082_v26, %v4081_v32  ;;  %v3042_v60 = vsel %vm433_vm4, %v2285_v35, %v2286_v23  ;;  %v4080_v35 = vunpack.i.h.bf16 %v2944_v59 }
  0xba   : > { %4128 = vst [vmem:[#allocation22_spill] sm:$0xff] %v3039_v33  ;;  %v3045_v30 = vsel %vm433_vm4, %v2286_v23, %v2290_v48  ;;  %v3048_v34 = vsel %vm433_vm4, %v2290_v48, %v2291_v50  ;;  %v3090_v32 = vpack.i.bf16 %v2790_v2, %v2787_v1 }
  0xbb   : > { %4129 = vst [vmem:[#allocation23_spill] sm:$0xff] %v3042_v60 }
  0xbc   : > { %4130 = vst [vmem:[#allocation24_spill] sm:$0xff] %v3045_v30  ;;  %2518 = vrot.lane.b32.xlu2 %v2811_v10, %s2738_s7  ;;  %2508 = vrot.lane.b32.xlu0 %v2814_v11, %s2737_s6 }
  0xbd   : > { %4131 = vst [vmem:[#allocation25_spill] sm:$0xff] %v3048_v34  ;;  %2513 = vrot.lane.b32.xlu1 %v2793_v3, %s2738_s7 }
  0xbe   : > { %v3055_v45 = vpop.permute.xlu2 %2353  ;;  %v2299_v47 = vpop.permute.xlu0 %2298 }
  0xbf   : > { %v2304_v29 = vpop.permute.xlu1 %2303  ;;  %v2301_v23 = vunpack.i.h.bf16 %v2299_v47  ;;  %v2300_v13 = vunpack.i.l.bf16 %v2299_v47 }
  0xc0   : > { %v2306_v61 = vunpack.i.h.bf16 %v2304_v29  ;;  %v2305_v50 = vunpack.i.l.bf16 %v2304_v29 }
  0xc1   : > { %v3061_v48 = vsel %vm487_vm5, %v4080_v35, %v2300_v13  ;;  %v3064_v11 = vsel %vm487_vm5, %v2300_v13, %v2301_v23 }
  0xc2   : > { %4132 = vst [vmem:[#allocation26_spill] sm:$0xff] %v3064_v11  ;;  %v3067_v3 = vsel %vm487_vm5, %v2301_v23, %v2305_v50  ;;  %v3070_v20 = vsel %vm487_vm5, %v2305_v50, %v2306_v61  ;;  %v3073_v62 = vsel %vm487_vm5, %v2306_v61, %v2310_v31 }
  0xc3   : > { %4133 = vst [vmem:[#allocation27_spill] sm:$0xff] %v3070_v20  ;;  %v2632_v20 = vpack.i.bf16 %v2808_v8, %v3264_v4  ;;  %v3298_v8 = vld [vmem:[%s2783_s17 + $0x38] sm:$0xff] }
  0xc4   : > { %4134 = vst [vmem:[#allocation28_spill] sm:$0xff] %v3073_v62  ;;  %2533 = vrot.lane.b32.xlu2 %v2811_v10, %s2739_s8  ;;  %2523 = vrot.lane.b32.xlu0 %v2811_v10, %s2740_s9 }
  0xc5   : > { %2528 = vrot.lane.b32.xlu1 %v2811_v10, %s2741_s10 }
  0xc6   : > { %v3081_v13 = vpop.permute.xlu2 %2368  ;;  %v3083_v29 = vpop.permute.xlu0 %2313 }
  0xc7   : > { %v2371_v47 = vunpack.i.h.bf16 %v3081_v13  ;;  %v4085_v61 = vunpack.i.l.bf16 %v3081_v13  ;;  %v2319_v31 = vpop.permute.xlu1 %2318  ;;  %v4084_v23 = vunpack.i.h.bf16 %v3083_v29 }
  0xc8   : > { %v2321_v50 = vunpack.i.h.bf16 %v2319_v31  ;;  %v2320_v35 = vunpack.i.l.bf16 %v2319_v31 }
  0xc9   : > { %v3095_v26 = vsel %vm649_vm8, %v4085_v61, %v2371_v47 }
  0xca   : > { %4135 = vst [vmem:[#allocation29_spill] sm:$0xff] %v3095_v26  ;;  %v3100_v51 = vsel %vm541_vm6, %v4084_v23, %v2320_v35  ;;  %v3105_v44 = vsel %vm541_vm6, %v2321_v50, %v2325_v52  ;;  %v3108_v31 = vsel %vm541_vm6, %v2320_v35, %v2321_v50 }
  0xcb   : > { %4136 = vst [vmem:[#allocation30_spill] sm:$0xff] %v3108_v31 }
  0xcc   : > { %2548 = vrot.lane.b32.xlu2 %v3090_v32, %s2741_s10  ;;  %2538 = vrot.lane.b32.xlu0 %v3090_v32, %s2740_s9 }
  0xcd   : > { %2543 = vrot.lane.b32.xlu1 %v2811_v10, %s2742_s11 }
  0xce   : > { %v3116_v1 = vpop.permute.xlu2 %2383  ;;  %v2329_v2 = vpop.permute.xlu0 %2328 }
  0xcf   : > { %v4087_v47 = vunpack.i.h.bf16 %v3116_v1  ;;  %v2385_v52 = vunpack.i.l.bf16 %v3116_v1  ;;  %v3120_v23 = vpop.permute.xlu1 %2333  ;;  %v2331_v35 = vunpack.i.h.bf16 %v2329_v2  ;;  %v2330_v50 = vunpack.i.l.bf16 %v2329_v2 }
  0xd0   : > { %v4086_v61 = vunpack.i.h.bf16 %v3120_v23  ;;  %v4154_v16 = vunpack.i.h.bf16 %v3116_v1 }
  0xd1   : > { %v3126_v58 = vsel %vm703_vm9, %v2385_v52, %v4087_v47  ;;  %v3131_v6 = vsel %vm541_vm6, %v4138_v27, %v2330_v50  ;;  %v3134_v34 = vsel %vm541_vm6, %v2330_v50, %v2331_v35 }
  0xd2   : > { %4137 = vst [vmem:[#allocation31_spill] sm:$0xff] %v3126_v58  ;;  %v3141_v2 = vsel %vm595_vm7, %v4086_v61, %v4141_v36 }
  0xd3   : > { %4139 = vst [vmem:[#allocation32_spill] sm:$0xff] %v3131_v6 }
  0xd4   : > { %4140 = vst [vmem:[#allocation33_spill] sm:$0xff] %v3134_v34  ;;  %2563 = vrot.lane.b32.xlu2 %v2811_v10, %s2743_s14  ;;  %2553 = vrot.lane.b32.xlu0 %v2811_v10, %s2744_s15 }
  0xd5   : > { %2558 = vrot.lane.b32.xlu1 %v3090_v32, %s2739_s8 }
  0xd6   : > { %v3149_v27 = vpop.permute.xlu2 %2398  ;;  %v2344_v49 = vpop.permute.xlu0 %2343 }
  0xd7   : > { %v4088_v35 = vunpack.i.h.bf16 %v3149_v27  ;;  %v4089_v50 = vunpack.i.l.bf16 %v3149_v27  ;;  %v2349_v36 = vpop.permute.xlu1 %2348  ;;  %v2346_v61 = vunpack.i.h.bf16 %v2344_v49  ;;  %v2345_v47 = vunpack.i.l.bf16 %v2344_v49 }
  0xd8   : > { %v2351_v34 = vunpack.i.h.bf16 %v2349_v36  ;;  %v2350_v26 = vunpack.i.l.bf16 %v2349_v36 }
  0xd9   : > { %v3156_v57 = vsel %vm595_vm7, %v4142_v43, %v2345_v47  ;;  %v3163_v22 = vsel %vm757_vm10, %v4089_v50, %v4088_v35  ;;  %v3166_v0 = vsel %vm595_vm7, %v2345_v47, %v2346_v61  ;;  %v4090_v47 = vunpack.i.h.bf16 %v3055_v45 }
  0xda   : > { %4143 = vst [vmem:[#allocation34_spill] sm:$0xff] %v3163_v22  ;;  %v3169_v49 = vsel %vm595_vm7, %v2346_v61, %v2350_v26  ;;  %v3172_v36 = vsel %vm595_vm7, %v2350_v26, %v2351_v34 }
  0xdb   : > { %4144 = vst [vmem:[#allocation35_spill] sm:$0xff] %v3166_v0 }
  0xdc   : > { %4145 = vst [vmem:[#allocation36_spill] sm:$0xff] %v3169_v49  ;;  %2578 = vrot.lane.b32.xlu2 %v3090_v32, %s2744_s15  ;;  %2568 = vrot.lane.b32.xlu0 %v3090_v32, %s2742_s11  ;;  %v4149_v49 = vunpack.i.l.bf16 %v3081_v13 }
  0xdd   : > { %4146 = vst [vmem:[#allocation37_spill] sm:$0xff] %v3172_v36  ;;  %2573 = vrot.lane.b32.xlu1 %v2811_v10, %s2745_s16 }
  0xde   : > { %v3180_v43 = vpop.permute.xlu2 %2413  ;;  %v2359_v24 = vpop.permute.xlu0 %2358 }
  0xdf   : > { %v2364_v61 = vpop.permute.xlu1 %2363  ;;  %v2361_v35 = vunpack.i.h.bf16 %v2359_v24  ;;  %v2360_v50 = vunpack.i.l.bf16 %v2359_v24  ;;  %v2415_v31 = vunpack.i.l.bf16 %v3180_v43 }
  0xe0   : > { %v2366_v26 = vunpack.i.h.bf16 %v2364_v61  ;;  %v2365_v34 = vunpack.i.l.bf16 %v2364_v61 }
  0xe1   : > { %v3186_v36 = vsel %vm649_vm8, %v4090_v47, %v2360_v50  ;;  %v3189_v30 = vsel %vm649_vm8, %v2360_v50, %v2361_v35 }
  0xe2   : > { %4147 = vst [vmem:[#allocation38_spill] sm:$0xff] %v3189_v30  ;;  %v3192_v62 = vsel %vm649_vm8, %v2361_v35, %v2365_v34  ;;  %v3195_v6 = vsel %vm649_vm8, %v2365_v34, %v2366_v26  ;;  %v3200_v24 = vsel %vm649_vm8, %v2366_v26, %v4149_v49 }
  0xe3   : > { %4148 = vst [vmem:[#allocation39_spill] sm:$0xff] %v3195_v6 }
  0xe4   : > { %4150 = vst [vmem:[#allocation40_spill] sm:$0xff] %v3200_v24  ;;  %2593 = vrot.lane.b32.xlu2 %v2811_v10, %s2746_s18  ;;  %2583 = vrot.lane.b32.xlu0 %v2811_v10, %s2747_s19 }
  0xe5   : > { %2588 = vrot.lane.b32.xlu1 %v3090_v32, %s2743_s14 }
  0xe6   : > { %v3208_v35 = vpop.permute.xlu2 %2428  ;;  %v3210_v50 = vpop.permute.xlu0 %2373 }
  0xe7   : > { %v2431_v13 = vunpack.i.h.bf16 %v3208_v35  ;;  %v4091_v49 = vunpack.i.l.bf16 %v3208_v35  ;;  %v3214_v61 = vpop.permute.xlu1 %2378  ;;  %v4163_v55 = vunpack.i.l.bf16 %v3208_v35 }
  0xe8   : > { %v2381_v26 = vunpack.i.h.bf16 %v3214_v61  ;;  %v4092_v34 = vunpack.i.l.bf16 %v3214_v61 }
  0xe9   : > { %v3221_v10 = vsel %vm811_vm11, %v4091_v49, %v2431_v13 }
  0xea   : > { %4151 = vst [vmem:[#allocation41_spill] sm:$0xff] %v3221_v10  ;;  %v3224_v47 = vsel %vm703_vm9, %v2381_v26, %v2385_v52  ;;  %v3229_v24 = vsel %vm703_vm9, %v4092_v34, %v2381_v26 }
  0xeb   : > { %4152 = vst [vmem:[#allocation42_spill] sm:$0xff] %v3229_v24 }
  0xec   : > { %2608 = vrot.lane.b32.xlu2 %v3090_v32, %s2746_s18  ;;  %2598 = vrot.lane.b32.xlu0 %v3090_v32, %s2745_s16 }
  0xed   : > { %2603 = vrot.lane.b32.xlu1 %v3090_v32, %s2747_s19 }
  0xee   : > { %v3237_v13 = vpop.permute.xlu2 %2443  ;;  %v2389_v49 = vpop.permute.xlu0 %2388 }
  0xef   : > { %v4094_v52 = vunpack.i.h.bf16 %v3237_v13  ;;  %v4093_v10 = vunpack.i.l.bf16 %v3237_v13  ;;  %v3241_v28 = vpop.permute.xlu1 %2393  ;;  %v2391_v26 = vunpack.i.h.bf16 %v2389_v49  ;;  %v2390_v34 = vunpack.i.l.bf16 %v2389_v49 }
  0xf0   : > { %v4168_v33 = vunpack.i.h.bf16 %v3237_v13 }
  0xf1   : > { %v3250_v32 = vsel %vm865_vm12, %v4093_v10, %v4094_v52  ;;  %v3255_v42 = vsel %vm703_vm9, %v4154_v16, %v2390_v34  ;;  %v3258_v60 = vsel %vm703_vm9, %v2390_v34, %v2391_v26 }
  0xf2   : > { %4153 = vst [vmem:[#allocation43_spill] sm:$0xff] %v3250_v32 }
  0xf3   : > { %4155 = vst [vmem:[#allocation44_spill] sm:$0xff] %v3255_v42 }
  0xf4   : > { %4156 = vst [vmem:[#allocation45_spill] sm:$0xff] %v3258_v60  ;;  %2623 = vrot.lane.b32.xlu2 %v2622_v56, %s2739_s8  ;;  %2613 = vrot.lane.b32.xlu0 %v2622_v56, %s2740_s9 }
  0xf5   : > { %2618 = vrot.lane.b32.xlu1 %v2622_v56, %s2741_s10 }
  0xf6   : > { %v3266_v49 = vpop.permute.xlu2 %2458  ;;  %v3268_v10 = vpop.permute.xlu0 %2403 }
  0xf7   : > { %v4095_v1 = vunpack.i.h.bf16 %v3266_v49  ;;  %v4096_v16 = vunpack.i.l.bf16 %v3266_v49  ;;  %v2409_v34 = vpop.permute.xlu1 %2408  ;;  %v2406_v26 = vunpack.i.h.bf16 %v3268_v10  ;;  %v4097_v52 = vunpack.i.l.bf16 %v3268_v10 }
  0xf8   : > { %v2411_v60 = vunpack.i.h.bf16 %v2409_v34  ;;  %v2410_v42 = vunpack.i.l.bf16 %v2409_v34 }
  0xf9   : > { %v3281_v41 = vsel %vm919_vm13, %v4096_v16, %v4095_v1  ;;  %v3286_v63 = vsel %vm757_vm10, %v4097_v52, %v2406_v26  ;;  %v1488_v1 = vld [vmem:[%s2783_s17 + $0x40] sm:$0xff]  ;;  %v3306_v52 = vld [vmem:[%s2783_s17 + $0x30] sm:$0xff] }
  0xfa   : > { %4157 = vst [vmem:[#allocation46_spill] sm:$0xff] %v3281_v41  ;;  %v3289_v18 = vsel %vm757_vm10, %v2406_v26, %v2410_v42  ;;  %v3292_v34 = vsel %vm757_vm10, %v2410_v42, %v2411_v60  ;;  %v3317_v14 = vpack.i.bf16 %v1488_v1, %v3298_v8  ;;  %v2647_v6 = vpack.i.bf16 %v3306_v52, %v3264_v4 }
  0xfb   : > { %4158 = vst [vmem:[#allocation47_spill] sm:$0xff] %v3286_v63 }
  0xfc   : > { %4159 = vst [vmem:[#allocation48_spill] sm:$0xff] %v3289_v18  ;;  %2638 = vrot.lane.b32.xlu2 %v2622_v56, %s2743_s14  ;;  %2628 = vrot.lane.b32.xlu0 %v2632_v20, %s2742_s11 }
  0xfd   : > { %4160 = vst [vmem:[#allocation49_spill] sm:$0xff] %v3292_v34  ;;  %2633 = vrot.lane.b32.xlu1 %v2632_v20, %s2744_s15 }
  0xfe   : > { %v3301_v16 = vpop.permute.xlu2 %2473  ;;  %v3303_v0 = vpop.permute.xlu0 %2418 }
  0xff   : > { %v4101_v26 = vunpack.i.h.bf16 %v3301_v16  ;;  %v2475_v42 = vunpack.i.l.bf16 %v3301_v16  ;;  %v3310_v60 = vpop.permute.xlu1 %2423  ;;  %v4098_v56 = vunpack.i.h.bf16 %v3303_v0  ;;  %v4100_v20 = vunpack.i.l.bf16 %v3303_v0 }
 0x100   : > { %v2426_v34 = vunpack.i.h.bf16 %v3310_v60  ;;  %v4099_v18 = vunpack.i.l.bf16 %v3310_v60 }
 0x101   : > { %v974_v46 = vsel %vm973_vm14, %v2475_v42, %v4101_v26  ;;  %v3329_v58 = vsel %vm811_vm11, %v4100_v20, %v4098_v56 }
 0x102   : > { %4161 = vst [vmem:[#allocation50_spill] sm:$0xff] %v3329_v58  ;;  %1790 = vmatpush.msra.mxu0 %v974_v46  ;;  %v3334_v1 = vsel %vm811_vm11, %v4099_v18, %v2426_v34  ;;  %v3339_v63 = vsel %vm811_vm11, %v2426_v34, %v4163_v55 }
 0x103   : > { %4162 = vst [vmem:[#allocation51_spill] sm:$0xff] %v3334_v1  ;;  %v3375_v1 = vld [vmem:[%s2783_s17 + $0x20] sm:$0xff] }
 0x104   : > { %4164 = vst [vmem:[#allocation52_spill] sm:$0xff] %v3339_v63  ;;  %2653 = vrot.lane.b32.xlu2 %v3317_v14, %s2741_s10  ;;  %2643 = vrot.lane.b32.xlu0 %v3317_v14, %s2740_s9  ;;  %v2677_v32 = vpack.i.bf16 %v3264_v4, %v3375_v1  ;;  %v2395_v4 = vunpack.i.l.bf16 %v3241_v28 }
 0x105   : > { %2648 = vrot.lane.b32.xlu1 %v2647_v6, %s2745_s16  ;;  %4167 = vst [vmem:[#allocation55_spill] sm:$0xff] %v3375_v1  ;;  %v4172_v1 = vunpack.i.h.bf16 %v3241_v28 }
 0x106   : > { %v3346_v46 = vpop.permute.xlu2 %2488  ;;  %v3348_v42 = vpop.permute.xlu0 %2433 }
 0x107   : > { %v2491_v56 = vunpack.i.h.bf16 %v3346_v46  ;;  %v4102_v35 = vunpack.i.l.bf16 %v3346_v46  ;;  %v3352_v18 = vpop.permute.xlu1 %2438 }
 0x108   : > { %v4103_v55 = vunpack.i.h.bf16 %v3352_v18  ;;  %v4104_v34 = vunpack.i.l.bf16 %v3352_v18 }
 0x109   : > { %v3359_v20 = vsel %vm973_vm14, %v4102_v35, %v2491_v56 }
 0x10a   : > { %4165 = vst [vmem:[#allocation53_spill] sm:$0xff] %v3359_v20  ;;  %v3366_v26 = vsel %vm865_vm12, %v4104_v34, %v4103_v55  ;;  %v2435_v55 = vunpack.i.l.bf16 %v3348_v42 }
 0x10b   : > { %4166 = vst [vmem:[#allocation54_spill] sm:$0xff] %v3366_v26 }
 0x10c   : > { %2668 = vrot.lane.b32.xlu2 %v2647_v6, %s2746_s18  ;;  %2658 = vrot.lane.b32.xlu0 %v2647_v6, %s2747_s19 }
 0x10d   : > { %2663 = vrot.lane.b32.xlu1 %v3317_v14, %s2739_s8 }
 0x10e   : > { %v3372_v63 = vpop.permute.xlu2 %2503  ;;  %v2449_v11 = vpop.permute.xlu0 %2448 }
 0x10f   : > { %v3377_v56 = vpop.permute.xlu1 %2453  ;;  %v2451_v35 = vunpack.i.h.bf16 %v2449_v11  ;;  %v2450_v20 = vunpack.i.l.bf16 %v2449_v11  ;;  %v4107_v11 = vunpack.i.h.bf16 %v3180_v43 }
 0x110   : > { %v4105_v34 = vunpack.i.h.bf16 %v3377_v56  ;;  %v2455_v6 = vunpack.i.l.bf16 %v3377_v56 }
 0x111   : > { %v3388_v30 = vsel %vm865_vm12, %v4168_v33, %v2450_v20  ;;  %v3391_v24 = vsel %vm865_vm12, %v2450_v20, %v2451_v35  ;;  %v4171_v33 = vunpack.i.h.bf16 %v3348_v42 }
 0x112   : > { %4169 = vst [vmem:[#allocation56_spill] sm:$0xff] %v3388_v30  ;;  %v920_v22 = vsel %vm919_vm13, %v2455_v6, %v4105_v34  ;;  %v812_v34 = vsel %vm811_vm11, %v2415_v31, %v4107_v11  ;;  %v758_v30 = vsel %vm757_vm10, %v2395_v4, %v4172_v1  ;;  %v2335_v11 = vunpack.i.l.bf16 %v3120_v23 }
 0x113   : > { %4170 = vst [vmem:[#allocation57_spill] sm:$0xff] %v3391_v24  ;;  %1791 = vmatpush.msra.mxu0 %v920_v22  ;;  %v866_v20 = vsel %vm865_vm12, %v2435_v55, %v4171_v33  ;;  %v2375_v22 = vunpack.i.l.bf16 %v3210_v50  ;;  %v2355_v33 = vunpack.i.l.bf16 %v3055_v45  ;;  %v4176_v1 = vunpack.i.h.bf16 %v3055_v45 }
 0x114   : > { %2673 = vrot.lane.b32.xlu0 %v3317_v14, %s2742_s11  ;;  %2683 = vrot.lane.b32.xlu2 %v3317_v14, %s2744_s15 }
 0x115   : > { %2678 = vrot.lane.b32.xlu1 %v2677_v32, %s2738_s7  ;;  %1792 = vmatpush.msra.mxu0 %v866_v20  ;;  %v650_v4 = vsel %vm649_vm8, %v2355_v33, %v4176_v1  ;;  %vm1135_vm8 = vcmask 457728  }
 0x116   : > { %v3410_v6 = vpop.permute.xlu0 %2463  ;;  %v3418_v32 = vpop.permute.xlu2 %2518 }
 0x117   : > { %v2469_v58 = vpop.permute.xlu1 %2468  ;;  %v2466_v24 = vunpack.i.h.bf16 %v3410_v6  ;;  %v4108_v55 = vunpack.i.l.bf16 %v3410_v6  ;;  %1793 = vmatpush.msra.mxu0 %v812_v34  ;;  %v4173_v34 = vunpack.i.h.bf16 %v3210_v50 }
 0x118   : > { %v2471_v20 = vunpack.i.h.bf16 %v2469_v58  ;;  %v2470_v35 = vunpack.i.l.bf16 %v2469_v58 }
 0x119   : > { %1794 = vmatpush.msra.mxu0 %v758_v30  ;;  %v3426_v31 = vsel %vm919_vm13, %v4108_v55, %v2466_v24  ;;  %v704_v26 = vsel %vm703_vm9, %v2375_v22, %v4173_v34  ;;  %v2315_v30 = vunpack.i.l.bf16 %v3083_v29  ;;  %v2275_v34 = vunpack.i.l.bf16 %v2999_v53 }
 0x11a   : > { %v3433_v41 = vsel %vm919_vm13, %v2466_v24, %v2470_v35  ;;  %v3436_v58 = vsel %vm919_vm13, %v2470_v35, %v2471_v20  ;;  %v2295_v24 = vunpack.i.l.bf16 %v2944_v59 }
 0x11b   : > { %4174 = vst [vmem:[#allocation58_spill] sm:$0xff] %v3433_v41  ;;  %1795 = vmatpush.msra.mxu0 %v704_v26  ;;  %v4177_v26 = vunpack.i.h.bf16 %v3120_v23  ;;  %v4179_v41 = vunpack.i.h.bf16 %v3301_v16 }
 0x11c   : > { %4175 = vst [vmem:[#allocation59_spill] sm:$0xff] %v3436_v58  ;;  %2688 = vrot.lane.b32.xlu0 %v3317_v14, %s2743_s14  ;;  %2698 = vrot.lane.b32.xlu2 %v3317_v14, %s2747_s19 }
 0x11d   : > { %2693 = vrot.lane.b32.xlu1 %v3317_v14, %s2745_s16  ;;  %1796 = vmatpush.msra.mxu0 %v650_v4  ;;  %v596_v22 = vsel %vm595_vm7, %v2335_v11, %v4177_v26  ;;  %v4178_v4 = vunpack.i.h.bf16 %v3083_v29  ;;  %v2707_v11 = vpack.i.bf16 %v3298_v8, %v3306_v52  ;;  %v4182_v52 = vunpack.i.l.bf16 %v3266_v49 }
 0x11e   : > { %v3449_v35 = vpop.permute.xlu0 %2478  ;;  %v4183_v8 = vunpack.i.h.bf16 %v3377_v56  ;;  %vm1189_vm7 = vcmask 449536  }
 0x11f   : > { %v2484_v20 = vpop.permute.xlu1 %2483  ;;  %v2481_v45 = vunpack.i.h.bf16 %v3449_v35  ;;  %v2480_v33 = vunpack.i.l.bf16 %v3449_v35  ;;  %1797 = vmatpush.msra.mxu0 %v596_v22  ;;  %v542_v58 = vsel %vm541_vm6, %v2315_v30, %v4178_v4  ;;  %v2255_v35 = vunpack.i.l.bf16 %v2971_v25  ;;  %v3469_v22 = vpop.permute.xlu2 %2533 }
 0x120   : > { %v2486_v1 = vunpack.i.h.bf16 %v2484_v20  ;;  %v2485_v55 = vunpack.i.l.bf16 %v2484_v20  ;;  %v4180_v20 = vunpack.i.h.bf16 %v2944_v59  ;;  %v921_v30 = vsel %vm919_vm13, %v4183_v8, %v4182_v52 }
 0x121   : > { %1798 = vmatpush.msra.mxu0 %v542_v58  ;;  %v975_v23 = vsel %vm973_vm14, %v4179_v41, %v2480_v33  ;;  %v3466_v26 = vsel %vm973_vm14, %v2480_v33, %v2481_v45  ;;  %v4181_v41 = vunpack.i.l.bf16 %v3346_v46  ;;  %v2235_v59 = vunpack.i.l.bf16 %v2866_v19 }
 0x122   : > { %v488_v29 = vsel %vm487_vm5, %v2295_v24, %v4180_v20  ;;  %1830 = vmatpush.msra.mxu2 %v975_v23  ;;  %v3475_v58 = vsel %vm973_vm14, %v2485_v55, %v2486_v1  ;;  %v4184_v24 = vunpack.i.h.bf16 %v2999_v53  ;;  %v4185_v46 = vunpack.i.l.bf16 %v3352_v18 }
 0x123   : > { %v3480_v16 = vsel %vm973_vm14, %v2486_v1, %v4181_v41  ;;  %1799 = vmatpush.msra.mxu0 %v488_v29  ;;  %v4186_v1 = vunpack.i.h.bf16 %v3348_v42  ;;  %v2215_v4 = vunpack.i.l.bf16 %v2849_v12  ;;  %v2505_v23 = vunpack.i.l.bf16 %v3372_v63 }
 0x124   : > { %2703 = vrot.lane.b32.xlu0 %v3317_v14, %s2746_s18  ;;  %v434_v33 = vsel %vm433_vm4, %v2275_v34, %v4184_v24  ;;  %1831 = vmatpush.msra.mxu2 %v921_v30  ;;  %v4187_v14 = vunpack.i.h.bf16 %v2971_v25  ;;  %v4189_v42 = vunpack.i.h.bf16 %v3180_v43  ;;  %v2195_v41 = vunpack.i.l.bf16 %v2873_v21 }
 0x125   : > { %2708 = vrot.lane.b32.xlu1 %v2707_v11, %s2738_s7  ;;  %1800 = vmatpush.msra.mxu0 %v434_v33  ;;  %v867_v56 = vsel %vm865_vm12, %v4186_v1, %v4185_v46  ;;  %v4188_v11 = vunpack.i.l.bf16 %v3303_v0  ;;  %v4190_v8 = vunpack.i.h.bf16 %v2866_v19  ;;  %v4192_v30 = vunpack.i.h.bf16 %v3241_v28 }
 0x126   : > { %v3501_v20 = vpop.permute.xlu0 %2493  ;;  %v380_v53 = vsel %vm379_vm3, %v2255_v35, %v4187_v14  ;;  %1832 = vmatpush.msra.mxu2 %v867_v56  ;;  %v4191_v35 = vunpack.i.l.bf16 %v3149_v27  ;;  %v4193_v43 = vunpack.i.h.bf16 %v2849_v12  ;;  %v4195_v28 = vunpack.i.h.bf16 %v3210_v50 }
 0x127   : > { %v3506_v34 = vpop.permute.xlu1 %2498  ;;  %1801 = vmatpush.msra.mxu0 %v380_v53  ;;  %v813_v29 = vsel %vm811_vm11, %v4189_v42, %v4188_v11  ;;  %v326_v25 = vsel %vm325_vm1, %v2235_v59, %v4190_v8  ;;  %v4194_v59 = vunpack.i.l.bf16 %v3214_v61  ;;  %v3538_v1 = vpop.permute.xlu2 %2548  ;;  %v4196_v12 = vunpack.i.h.bf16 %v2873_v21 }
 0x128   : > { %v2501_v52 = vunpack.i.h.bf16 %v3506_v34  ;;  %1833 = vmatpush.msra.mxu2 %v813_v29  ;;  %v759_v24 = vsel %vm757_vm10, %v4192_v30, %v4191_v35  ;;  %v272_v33 = vsel %vm271_vm0, %v2215_v4, %v4193_v43  ;;  %v171_v4 = vld [vmem:[%s2783_s17] sm:$0xff]  ;;  %v2506_v53 = vunpack.i.h.bf16 %v3372_v63 }
 0x129   : > { %1802 = vmatpush.msra.mxu0 %v326_v25  ;;  %v705_v46 = vsel %vm703_vm9, %v4195_v28, %v4194_v59  ;;  %v218_v56 = vsel %vm217_vm2, %v2195_v41, %v4196_v12  ;;  %v977_v42 = vsel %vm973_vm14, %v2481_v45, %v2485_v55  ;;  %v4197_v21 = vunpack.i.l.bf16 %v3410_v6 }
 0x12a   : > { %1834 = vmatpush.msra.mxu2 %v759_v24  ;;  %v3531_v19 = vsel %vm1027_vm15, %v2501_v52, %v2505_v23  ;;  %v4198_v29 = vunpack.i.h.bf16 %v3266_v49  ;;  %v4199_v55 = vunpack.i.l.bf16 %v3237_v13  ;;  %v4201_v49 = vunpack.i.l.bf16 %v3310_v60 }
 0x12b   : > { %1803 = vmatpush.msra.mxu0 %v272_v33  ;;  %v4202_v45 = vunpack.i.h.bf16 %v3303_v0  ;;  %vm1567_vm0 = vcmask 277504   ;;  %v4203_v13 = vunpack.i.l.bf16 %v3268_v10  ;;  %v4204_v0 = vunpack.i.h.bf16 %v3149_v27 }
 0x12c   : > { %1835 = vmatpush.msra.mxu2 %v705_v46  ;;  %v923_v41 = vsel %vm919_vm13, %v4198_v29, %v4197_v21  ;;  %vm1513_vm1 = vcmask 285696   ;;  %v2536_v24 = vunpack.i.h.bf16 %v3469_v22  ;;  %v2535_v43 = vunpack.i.l.bf16 %v3469_v22 }
 0x12d   : > { %1804 = vmatpush.msra.mxu0 %v218_v56  ;;  %v815_v25 = vsel %vm811_vm11, %v4202_v45, %v4201_v49  ;;  %v761_v60 = vsel %vm757_vm10, %v4204_v0, %v4203_v13  ;;  %vm1459_vm2 = vcmask 293888   ;;  %vm1405_vm3 = vcmask 359424  }
 0x12e   : > { %v2509_v14 = vpop.permute.xlu0 %2508  ;;  %1836 = vmatpush.msra.mxu2 %v3186_v36  ;;  %vm1351_vm4 = vcmask 367616   ;;  %vm1297_vm5 = vcmask 375808   ;;  %vm1243_vm6 = vcmask 441344   ;;  %vm1081_vm9 = vcmask 48128  }
 0x12f   : > { %v3546_v11 = vpop.permute.xlu1 %2513  ;;  %v2511_v61 = vunpack.i.h.bf16 %v2509_v14  ;;  %v2510_v50 = vunpack.i.l.bf16 %v2509_v14  ;;  %1805 = vmatpush.msra.mxu0 %v171_v4  ;;  %v3575_v35 = vpop.permute.xlu2 %2563  ;;  %vm1786_vm10 = vcmask 719872  }
 0x130   : > { %1837 = vmatpush.msra.mxu2 %v3141_v2  ;;  %v4200_v2 = vunpack.i.h.bf16 %v3352_v18  ;;  %v2566_v56 = vunpack.i.h.bf16 %v3575_v35 }
 0x131   : > { %1910 = vmatpush.msrb.mxu0 %v977_v42  ;;  %v3558_v36 = vsel %vm1027_vm15, %v2506_v53, %v2510_v50  ;;  %v3561_v8 = vsel %vm1027_vm15, %v2510_v50, %v2511_v61 }
 0x132   : > { %1838 = vmatpush.msra.mxu2 %v3100_v51  ;;  %v869_v6 = vsel %vm865_vm12, %v4200_v2, %v4199_v55 }
 0x133   : > { %1911 = vmatpush.msrb.mxu0 %v923_v41 }
 0x134   : > { %1839 = vmatpush.msra.mxu2 %v3061_v48 }
 0x135   : > { %1912 = vmatpush.msrb.mxu0 %v869_v6 }
 0x136   : > { %v3577_v30 = vpop.permute.xlu0 %2523  ;;  %1840 = vmatpush.msra.mxu2 %v3020_v7 }
 0x137   : > { %1913 = vmatpush.msrb.mxu0 %v815_v25  ;;  %v3580_v18 = vpop.permute.xlu1 %2528  ;;  %v2526_v51 = vunpack.i.h.bf16 %v3577_v30  ;;  %v2525_v48 = vunpack.i.l.bf16 %v3577_v30 }
 0x138   : > { %v2531_v7 = vunpack.i.h.bf16 %v3580_v18  ;;  %v2530_v33 = vunpack.i.l.bf16 %v3580_v18  ;;  %1841 = vmatpush.msra.mxu2 %v2982_v37  ;;  %v1461_v37 = vsel %vm1459_vm2, %v2535_v43, %v2536_v24  ;;  %v2495_v18 = vunpack.i.l.bf16 %v3501_v20 }
 0x139   : > { %1914 = vmatpush.msrb.mxu0 %v761_v60  ;;  %v1569_v10 = vsel %vm1567_vm0, %v2525_v48, %v2526_v51 }
 0x13a   : > { %1842 = vmatpush.msra.mxu2 %v2950_v9  ;;  %v1515_v27 = vsel %vm1513_vm1, %v2530_v33, %v2531_v7  ;;  %1855 = vmatpush.msra.mxu3 %v1569_v10  ;;  %v2550_v9 = vunpack.i.l.bf16 %v3538_v1 }
 0x13b   : > { %1915 = vmatpush.msrb.mxu0 %v3224_v47 }
 0x13c   : > { %1843 = vmatpush.msra.mxu2 %v2858_v17  ;;  %1856 = vmatpush.msra.mxu3 %v1515_v27  ;;  %v3615_v17 = vpop.permute.xlu2 %2578  ;;  %v1514_v12 = vsel %vm1513_vm1, %v2550_v9, %v2530_v33  ;;  %v2520_v27 = vunpack.i.l.bf16 %v3418_v32 }
 0x13d   : > { %1916 = vmatpush.msrb.mxu0 %v3192_v62  ;;  %v2580_v41 = vunpack.i.l.bf16 %v3615_v17 }
 0x13e   : > { %v3608_v59 = vpop.permute.xlu0 %2538  ;;  %1844 = vmatpush.msra.mxu2 %v2896_v39  ;;  %1857 = vmatpush.msra.mxu3 %v1461_v37  ;;  %v2516_v37 = vunpack.i.h.bf16 %v3546_v11 }
 0x13f   : > { %1917 = vmatpush.msrb.mxu0 %v3156_v57  ;;  %v3612_v47 = vpop.permute.xlu1 %2543  ;;  %v2540_v28 = vunpack.i.l.bf16 %v3608_v59 }
 0x140   : > { %v2546_v62 = vunpack.i.h.bf16 %v3612_v47  ;;  %v2545_v46 = vunpack.i.l.bf16 %v3612_v47 }
 0x141   : > { %1918 = vmatpush.msrb.mxu0 %v3105_v44  ;;  %v1568_v57 = vsel %vm1567_vm0, %v2540_v28, %v2525_v48  ;;  %v2565_v44 = vunpack.i.l.bf16 %v3575_v35  ;;  %v4205_v35 = vld [vmem:[#allocation46_spill] sm:$0xff] }
 0x142   : > { %1815 = vmatpush.msra.mxu1 %v1568_v57  ;;  %v1407_v39 = vsel %vm1405_vm3, %v2545_v46, %v2546_v62  ;;  %v3686_v57 = vld [vmem:[%s4072_s1] sm:$0xff] }
 0x143   : > { %1919 = vmatpush.msrb.mxu0 %v3067_v3  ;;  %1858 = vmatpush.msra.mxu3 %v1407_v39 }
 0x144   : > { %1816 = vmatpush.msra.mxu1 %v1514_v12  ;;  %v3645_v21 = vpop.permute.xlu2 %2593  ;;  %v2500_v12 = vunpack.i.l.bf16 %v3506_v34  ;;  %1806 = vmatmul.f32.vlgmr.msra.gmra.mxu0 %v3686_v57 }
 0x145   : > { %1920 = vmatpush.msrb.mxu0 %v3032_v5  ;;  %v172_v5 = vld [vmem:[%s2783_s17 + $0x8] sm:$0xff]  ;;  %v2596_v48 = vunpack.i.h.bf16 %v3645_v21  ;;  %v2595_v13 = vunpack.i.l.bf16 %v3645_v21 }
 0x146   : > { %v3630_v4 = vpop.permute.xlu0 %2553  ;;  %1845 = vmatpush.msra.mxu2 %v172_v5  ;;  %v1083_v5 = vsel %vm1081_vm9, %v2516_v37, %v2520_v27 }
 0x147   : > { %1921 = vmatpush.msrb.mxu0 %v2987_v38  ;;  %v3632_v3 = vpop.permute.xlu1 %2558  ;;  %v2556_v14 = vunpack.i.h.bf16 %v3630_v4  ;;  %v2555_v61 = vunpack.i.l.bf16 %v3630_v4  ;;  %v1299_v38 = vsel %vm1297_vm5, %v2565_v44, %v2566_v56  ;;  %v1137_v28 = vsel %vm1135_vm8, %v2595_v13, %v2596_v48  ;;  %1846 = vmatmul.f32.vlgmr.msra.gmra.mxu2 %v3686_v57 }
 0x148   : > { %v2560_v50 = vunpack.i.l.bf16 %v3632_v3 }
 0x149   : > { %1922 = vmatpush.msrb.mxu0 %v2956_v15  ;;  %v1353_v42 = vsel %vm1351_vm4, %v2555_v61, %v2556_v14  ;;  %v1352_v45 = vsel %vm1351_vm4, %v2580_v41, %v2555_v61  ;;  %v2496_v61 = vunpack.i.h.bf16 %v3501_v20 }
 0x14a   : > { %v1460_v29 = vsel %vm1459_vm2, %v2560_v50, %v2535_v43  ;;  %1859 = vmatpush.msra.mxu3 %v1353_v42  ;;  %v2541_v50 = vunpack.i.h.bf16 %v3608_v59 }
 0x14b   : > { %1923 = vmatpush.msrb.mxu0 %v2925_v54  ;;  %1817 = vmatpush.msra.mxu1 %v1460_v29  ;;  %v1029_v59 = vsel %vm1027_vm15, %v2496_v61, %v2500_v12 }
 0x14c   : > { %1860 = vmatpush.msra.mxu3 %v1299_v38  ;;  %v3663_v25 = vpop.permute.xlu2 %2608 }
 0x14d   : > { %1924 = vmatpush.msrb.mxu0 %v2899_v40 }
 0x14e   : > { %v3650_v15 = vpop.permute.xlu0 %2568 }
 0x14f   : > { %v3653_v55 = vpop.permute.xlu1 %2573  ;;  %v2570_v2 = vunpack.i.l.bf16 %v3650_v15 }
 0x150   : > { %v2576_v6 = vunpack.i.h.bf16 %v3653_v55  ;;  %v2575_v54 = vunpack.i.l.bf16 %v3653_v55 }
 0x151   : > { %v1406_v49 = vsel %vm1405_vm3, %v2570_v2, %v2545_v46  ;;  %v174_v46 = vld [vmem:[%s2783_s17 + $0x18] sm:$0xff]  ;;  %v3711_v2 = vld [vmem:[%s4072_s1 + $0x8] sm:$0xff] }
 0x152   : > { %1818 = vmatpush.msra.mxu1 %v1406_v49  ;;  %v1245_v40 = vsel %vm1243_vm6, %v2575_v54, %v2576_v6  ;;  %1925 = vmatpush.msrb.mxu0 %v174_v46  ;;  %v1028_v46 = vsel %vm1027_vm15, %v2495_v18, %v2496_v61 }
 0x153   : > { %1861 = vmatpush.msra.mxu3 %v1245_v40  ;;  %v1570_v40 = vsel %vm1567_vm0, %v2526_v51, %v2541_v50  ;;  %1926 = vmatmul.f32.vlgmr.msrb.gmra.mxu0 %v3686_v57  ;;  %v2581_v51 = vunpack.i.h.bf16 %v3615_v17 }
 0x154   : > { %1819 = vmatpush.msra.mxu1 %v1352_v45  ;;  %v3698_v42 = vpop.permute.xlu2 %2623  ;;  %v2610_v45 = vunpack.i.l.bf16 %v3663_v25 }
 0x155   : > { %v1354_v47 = vsel %vm1351_vm4, %v2556_v14, %v2581_v51  ;;  %v2611_v14 = vunpack.i.h.bf16 %v3663_v25 }
 0x156   : > { %v3667_v0 = vpop.permute.xlu0 %2583 }
 0x157   : > { %v3669_v60 = vpop.permute.xlu1 %2588  ;;  %v2586_v43 = vunpack.i.h.bf16 %v3667_v0  ;;  %v2585_v33 = vunpack.i.l.bf16 %v3667_v0  ;;  %v4207_v0 = vld [vmem:[#allocation50_spill] sm:$0xff] }
 0x158   : > { %v2590_v10 = vunpack.i.l.bf16 %v3669_v60 }
 0x159   : > { %v1191_v9 = vsel %vm1189_vm7, %v2585_v33, %v2586_v43 }
 0x15a   : > { %v1298_v39 = vsel %vm1297_vm5, %v2590_v10, %v2565_v44  ;;  %1862 = vmatpush.msra.mxu3 %v1191_v9  ;;  %v2551_v44 = vunpack.i.h.bf16 %v3538_v1  ;;  %v2561_v1 = vunpack.i.h.bf16 %v3632_v3  ;;  %v2571_v9 = vunpack.i.h.bf16 %v3650_v15 }
 0x15b   : > { %1820 = vmatpush.msra.mxu1 %v1298_v39  ;;  %v2515_v3 = vunpack.i.l.bf16 %v3546_v11 }
 0x15c   : > { %1863 = vmatpush.msra.mxu3 %v1137_v28  ;;  %v1516_v28 = vsel %vm1513_vm1, %v2531_v7, %v2551_v44  ;;  %v1462_v15 = vsel %vm1459_vm2, %v2536_v24, %v2561_v1  ;;  %v1136_v7 = vsel %vm1135_vm8, %v2610_v45, %v2595_v13  ;;  %v3745_v20 = vpop.permute.xlu2 %2638  ;;  %v1030_v45 = vsel %vm1027_vm15, %v2500_v12, %v2501_v52  ;;  %v4210_v12 = vld [vmem:[#allocation38_spill] sm:$0xff] }
 0x15d   : > { %v1082_v24 = vsel %vm1081_vm9, %v2515_v3, %v2516_v37 }
 0x15e   : > { %v3700_v38 = vpop.permute.xlu0 %2598  ;;  %1864 = vmatpush.msra.mxu3 %v1083_v5 }
 0x15f   : > { %v3702_v29 = vpop.permute.xlu1 %2603  ;;  %v2600_v41 = vunpack.i.l.bf16 %v3700_v38  ;;  %v2601_v13 = vunpack.i.h.bf16 %v3700_v38  ;;  %v4206_v38 = vld [vmem:[#allocation54_spill] sm:$0xff] }
 0x160   : > { %v2605_v49 = vunpack.i.l.bf16 %v3702_v29  ;;  %1865 = vmatpush.msra.mxu3 %v1029_v59  ;;  %v2606_v39 = vunpack.i.h.bf16 %v3702_v29  ;;  %v1138_v59 = vsel %vm1135_vm8, %v2596_v48, %v2611_v14  ;;  %v4222_v29 = vld [vmem:[#allocation35_spill] sm:$0xff] }
 0x161   : > { %v1244_v10 = vsel %vm1243_vm6, %v2600_v41, %v2575_v54  ;;  %2147 = vmatmul.msk.f32.vlgmr.msra.gmra.mxu3 %vm1786_vm10, %v3711_v2  ;;  %v2591_v54 = vunpack.i.h.bf16 %v3669_v60  ;;  %v1246_v61 = vsel %vm1243_vm6, %v2576_v6, %v2601_v13 }
 0x162   : > { %1895 = vmatpush.msrb.mxu3 %v1570_v40  ;;  %1821 = vmatpush.msra.mxu1 %v1244_v10  ;;  %v1190_v30 = vsel %vm1189_vm7, %v2605_v49, %v2585_v33  ;;  %v1408_v33 = vsel %vm1405_vm3, %v2546_v62, %v2571_v9  ;;  %v2625_v62 = vunpack.i.l.bf16 %v3698_v42  ;;  %v1192_v55 = vsel %vm1189_vm7, %v2586_v43, %v2606_v39  ;;  %v4208_v40 = vld [vmem:[#allocation34_spill] sm:$0xff] }
 0x163   : > { %v1300_v5 = vsel %vm1297_vm5, %v2566_v56, %v2591_v54  ;;  %v2521_v56 = vunpack.i.h.bf16 %v3418_v32 }
 0x164   : > { %1896 = vmatpush.msrb.mxu3 %v1516_v28  ;;  %1822 = vmatpush.msra.mxu1 %v1190_v30  ;;  %v3798_v49 = vpop.permute.xlu2 %2653 }
 0x165   : > { %v1084_v21 = vsel %vm1081_vm9, %v2520_v27, %v2521_v56  ;;  %v2655_v3 = vunpack.i.l.bf16 %v3798_v49 }
 0x166   : > { %1897 = vmatpush.msrb.mxu3 %v1462_v15  ;;  %v3736_v11 = vpop.permute.xlu0 %2613  ;;  %1823 = vmatpush.msra.mxu1 %v1136_v7  ;;  %v4211_v15 = vld [vmem:[#allocation22_spill] sm:$0xff]  ;;  %v4212_v7 = vld [vmem:[#allocation43_spill] sm:$0xff] }
 0x167   : > { %v3741_v17 = vpop.permute.xlu1 %2618  ;;  %v2615_v22 = vunpack.i.l.bf16 %v3736_v11  ;;  %v2616_v10 = vunpack.i.h.bf16 %v3736_v11 }
 0x168   : > { %1898 = vmatpush.msrb.mxu3 %v1408_v33  ;;  %v2620_v60 = vunpack.i.l.bf16 %v3741_v17  ;;  %1824 = vmatpush.msra.mxu1 %v1082_v24  ;;  %v2621_v34 = vunpack.i.h.bf16 %v3741_v17  ;;  %v4214_v24 = vld [vmem:[#allocation51_spill] sm:$0xff] }
 0x169   : > { %v1571_v37 = vsel %vm1567_vm0, %v2541_v50, %v2615_v22 }
 0x16a   : > { %1899 = vmatpush.msrb.mxu3 %v1354_v47  ;;  %1825 = vmatpush.msra.mxu1 %v1028_v46  ;;  %v1517_v4 = vsel %vm1513_vm1, %v2551_v44, %v2620_v60  ;;  %v4215_v47 = vld [vmem:[#allocation26_spill] sm:$0xff]  ;;  %v1518_v11 = vsel %vm1513_vm1, %v2620_v60, %v2621_v34  ;;  %v1780_v60 = vld [vmem:[%s4073_s2] sm:$0xff] }
 0x16b   : > { %1935 = vmatpush.msrb.mxu2 %v1571_v37  ;;  %2146 = vmatmul.msk.f32.vlgmr.msra.gmra.mxu1 %vm1786_vm10, %v3711_v2 }
 0x16c   : > { %1870 = vmatpush.msrb.mxu1 %v3466_v26  ;;  %1900 = vmatpush.msrb.mxu3 %v1300_v5  ;;  %v1463_v26 = vsel %vm1459_vm2, %v2561_v1, %v2625_v62  ;;  %v2640_v1 = vunpack.i.l.bf16 %v3745_v20  ;;  %v3844_v33 = vpop.permute.xlu2 %2668 }
 0x16d   : > { %1936 = vmatpush.msrb.mxu2 %v1517_v4  ;;  %v2670_v37 = vunpack.i.l.bf16 %v3844_v33 }
 0x16e   : > { %1871 = vmatpush.msrb.mxu1 %v4205_v35  ;;  %1901 = vmatpush.msrb.mxu3 %v1246_v61  ;;  %v3776_v50 = vpop.permute.xlu0 %2628  ;;  %v1301_v27 = vsel %vm1297_vm5, %v2591_v54, %v2640_v1  ;;  %v4213_v54 = vld [vmem:[#allocation30_spill] sm:$0xff]  ;;  %v2626_v35 = vunpack.i.h.bf16 %v3698_v42 }
 0x16f   : > { %1937 = vmatpush.msrb.mxu2 %v1463_v26  ;;  %v3783_v6 = vpop.permute.xlu1 %2633  ;;  %v2630_v44 = vunpack.i.l.bf16 %v3776_v50  ;;  %v4217_v61 = vld [vmem:[#allocation10_spill] sm:$0xff] }
 0x170   : > { %1872 = vmatpush.msrb.mxu1 %v4206_v38  ;;  %1902 = vmatpush.msrb.mxu3 %v1192_v55  ;;  %v2635_v41 = vunpack.i.l.bf16 %v3783_v6  ;;  %v4218_v55 = vld [vmem:[#allocation31_spill] sm:$0xff]  ;;  %v4219_v38 = vld [vmem:[#allocation18_spill] sm:$0xff]  ;;  %v1464_v17 = vsel %vm1459_vm2, %v2625_v62, %v2626_v35 }
 0x171   : > { %v1409_v43 = vsel %vm1405_vm3, %v2571_v9, %v2630_v44  ;;  %v4209_v9 = vld [vmem:[#allocation42_spill] sm:$0xff]  ;;  %v4231_v62 = vld [vmem:[#allocation11_spill] sm:$0xff] }
 0x172   : > { %1873 = vmatpush.msrb.mxu1 %v4207_v0  ;;  %1903 = vmatpush.msrb.mxu3 %v1138_v59  ;;  %v1355_v48 = vsel %vm1351_vm4, %v2581_v51, %v2635_v41  ;;  %v4220_v0 = vld [vmem:[#allocation39_spill] sm:$0xff] }
 0x173   : > { %1938 = vmatpush.msrb.mxu2 %v1409_v43 }
 0x174   : > { %1874 = vmatpush.msrb.mxu1 %v4208_v40  ;;  %1904 = vmatpush.msrb.mxu3 %v1084_v21  ;;  %v4221_v21 = vld [vmem:[#allocation14_spill] sm:$0xff]  ;;  %v1139_v40 = vsel %vm1135_vm8, %v2611_v14, %v2670_v37  ;;  %v2636_v14 = vunpack.i.h.bf16 %v3783_v6 }
 0x175   : > { %1939 = vmatpush.msrb.mxu2 %v1355_v48  ;;  %v4223_v48 = vld [vmem:[#allocation3_spill] sm:$0xff] }
 0x176   : > { %1875 = vmatpush.msrb.mxu1 %v4209_v9  ;;  %1905 = vmatpush.msrb.mxu3 %v1030_v45  ;;  %v3819_v28 = vpop.permute.xlu0 %2643  ;;  %v4224_v9 = vld [vmem:[#allocation19_spill] sm:$0xff] }
 0x177   : > { %1940 = vmatpush.msrb.mxu2 %v1301_v27  ;;  %v3824_v30 = vpop.permute.xlu1 %2648  ;;  %v2645_v52 = vunpack.i.l.bf16 %v3819_v28  ;;  %2148 = vmatmul.msk.f32.vlgmr.msrb.gmra.mxu3 %vm1786_vm10, %v3711_v2  ;;  %v173_v27 = vld [vmem:[%s2783_s17 + $0x10] sm:$0xff] }
 0x178   : > { %1950 = vmatpush.msra.mxu3 %v3475_v58  ;;  %1876 = vmatpush.msrb.mxu1 %v4210_v12  ;;  %v2650_v51 = vunpack.i.l.bf16 %v3824_v30  ;;  %v2631_v12 = vunpack.i.h.bf16 %v3776_v50  ;;  %v1356_v50 = vsel %vm1351_vm4, %v2635_v41, %v2636_v14 }
 0x179   : > { %v1573_v58 = vsel %vm1567_vm0, %v2616_v10, %v2645_v52 }
 0x17a   : > { %1951 = vmatpush.msra.mxu3 %v3426_v31  ;;  %1877 = vmatpush.msrb.mxu1 %v4211_v15  ;;  %v1247_v18 = vsel %vm1243_vm6, %v2601_v13, %v2650_v51  ;;  %v1519_v31 = vsel %vm1513_vm1, %v2621_v34, %v2655_v3  ;;  %v4216_v13 = vld [vmem:[#allocation47_spill] sm:$0xff]  ;;  %v2641_v34 = vunpack.i.h.bf16 %v3745_v20 }
 0x17b   : > { %2015 = vmatpush.msra.mxu0 %v1573_v58  ;;  %1941 = vmatpush.msrb.mxu2 %v1247_v18  ;;  %v4225_v58 = vld [vmem:[#allocation6_spill] sm:$0xff] }
 0x17c   : > { %1952 = vmatpush.msra.mxu3 %v4212_v7  ;;  %1878 = vmatpush.msrb.mxu1 %v4213_v54  ;;  %v4226_v54 = vld [vmem:[#allocation27_spill] sm:$0xff] }
 0x17d   : > { %2016 = vmatpush.msra.mxu0 %v1519_v31  ;;  %v1572_v31 = vsel %vm1567_vm0, %v2615_v22, %v2616_v10  ;;  %v4228_v22 = vld [vmem:[#allocation7_spill] sm:$0xff] }
 0x17e   : > { %1953 = vmatpush.msra.mxu3 %v4214_v24  ;;  %1879 = vmatpush.msrb.mxu1 %v4215_v47  ;;  %v3848_v46 = vpop.permute.xlu0 %2658 }
 0x17f   : > { %v3852_v5 = vpop.permute.xlu1 %2663  ;;  %v2660_v4 = vunpack.i.l.bf16 %v3848_v46 }
 0x180   : > { %1954 = vmatpush.msra.mxu3 %v4216_v13  ;;  %1880 = vmatpush.msrb.mxu1 %v4217_v61  ;;  %v2665_v26 = vunpack.i.l.bf16 %v3852_v5  ;;  %v4227_v13 = vld [vmem:[#allocation23_spill] sm:$0xff]  ;;  %v2666_v6 = vunpack.i.h.bf16 %v3852_v5 }
 0x181   : > { %v1193_v59 = vsel %vm1189_vm7, %v2606_v39, %v2660_v4  ;;  %v3876_v39 = vpop.permute.xlu2 %2683 }
 0x182   : > { %1955 = vmatpush.msra.mxu3 %v4218_v55  ;;  %1881 = vmatpush.msrb.mxu1 %v4219_v38  ;;  %v1465_v43 = vsel %vm1459_vm2, %v2626_v35, %v2665_v26  ;;  %v2685_v18 = vunpack.i.l.bf16 %v3876_v39  ;;  %v2748_v55 = vmov 0   ;;  %v4230_v38 = vld [vmem:[#allocation58_spill] sm:$0xff]  ;;  %v1410_v35 = vsel %vm1405_vm3, %v2630_v44, %v2631_v12 }
 0x183   : > { %1942 = vmatpush.msrb.mxu2 %v1193_v59  ;;  %2017 = vmatpush.msra.mxu0 %v1465_v43  ;;  %v2646_v59 = vunpack.i.h.bf16 %v3819_v28  ;;  %v2651_v43 = vunpack.i.h.bf16 %v3824_v30  ;;  %v2656_v44 = vunpack.i.h.bf16 %v3798_v49  ;;  %v4237_v30 = vld [vmem:[#allocation44_spill] sm:$0xff] }
 0x184   : > { %1956 = vmatpush.msra.mxu3 %v4220_v0  ;;  %1882 = vmatpush.msrb.mxu1 %v4221_v21  ;;  %v1357_v10 = vsel %vm1351_vm4, %v2636_v14, %v2685_v18  ;;  %v2661_v21 = vunpack.i.h.bf16 %v3848_v46 }
 0x185   : > { %1943 = vmatpush.msrb.mxu2 %v1139_v40  ;;  %2712 = vset.pattern.permute.xlu2 %v2748_v55  ;;  %v1574_v14 = vsel %vm1567_vm0, %v2645_v52, %v2646_v59  ;;  %v1520_v52 = vsel %vm1513_vm1, %v2655_v3, %v2656_v44  ;;  %v4251_v59 = vld [vmem:[#allocation8_spill] sm:$0xff]  ;;  %v4260_v44 = vld [vmem:[#allocation13_spill] sm:$0xff] }
 0x186   : > { %1957 = vmatpush.msra.mxu3 %v4222_v29  ;;  %1883 = vmatpush.msrb.mxu1 %v4223_v48  ;;  %v3879_v45 = vpop.permute.xlu0 %2673  ;;  %v4232_v29 = vld [vmem:[#allocation56_spill] sm:$0xff]  ;;  %v4233_v48 = vld [vmem:[#allocation5_spill] sm:$0xff] }
 0x187   : > { %v3884_v15 = vpop.permute.xlu1 %2678  ;;  %v2675_v25 = vunpack.i.l.bf16 %v3879_v45  ;;  %1783 = vperm.xlu2 %2712, %v1780_v60   ;;  %v2676_v41 = vunpack.i.h.bf16 %v3879_v45  ;;  %2713 = vset.pattern.permute.xlu0 %v2748_v55  ;;  %v176_v55 = vld [vmem:[%s2783_s17 + $0x28] sm:$0xff] }
 0x188   : > { %1958 = vmatpush.msra.mxu3 %v4224_v9  ;;  %1884 = vmatpush.msrb.mxu1 %v4225_v58  ;;  %v2680_v7 = vunpack.i.l.bf16 %v3884_v15  ;;  %v4234_v9 = vld [vmem:[#allocation52_spill] sm:$0xff] }
 0x189   : > { %v1411_v24 = vsel %vm1405_vm3, %v2631_v12, %v2675_v25  ;;  %v3923_v61 = vpop.permute.xlu2 %2698  ;;  %v1302_v12 = vsel %vm1297_vm5, %v2640_v1, %v2641_v34  ;;  %v1248_v1 = vsel %vm1243_vm6, %v2650_v51, %v2651_v43  ;;  %v1194_v51 = vsel %vm1189_vm7, %v2660_v4, %v2661_v21 }
 0x18a   : > { %1959 = vmatpush.msra.mxu3 %v4226_v54  ;;  %1885 = vmatpush.msrb.mxu1 %v173_v27  ;;  %v1085_v47 = vsel %vm1081_vm9, %v2521_v56, %v2680_v7  ;;  %v4229_v56 = vld [vmem:[#allocation15_spill] sm:$0xff]  ;;  %v2700_v40 = vunpack.i.l.bf16 %v3923_v61  ;;  %v2671_v54 = vunpack.i.h.bf16 %v3844_v33  ;;  %v1412_v49 = vsel %vm1405_vm3, %v2675_v25, %v2676_v41 }
 0x18b   : > { %1944 = vmatpush.msrb.mxu2 %v1085_v47  ;;  %2018 = vmatpush.msra.mxu0 %v1411_v24  ;;  %v4235_v27 = vld [vmem:[#allocation55_spill] sm:$0xff]  ;;  %v2686_v47 = vunpack.i.h.bf16 %v3876_v39  ;;  %v2701_v33 = vunpack.i.h.bf16 %v3923_v61  ;;  %v1032_v39 = vsel %vm1027_vm15, %v2505_v23, %v2506_v53  ;;  %v4243_v23 = vld [vmem:[#allocation24_spill] sm:$0xff] }
 0x18c   : > { %1960 = vmatpush.msra.mxu3 %v4227_v13  ;;  %1975 = vmatpush.msra.mxu1 %v1572_v31  ;;  %v4236_v31 = vld [vmem:[#allocation48_spill] sm:$0xff]  ;;  %v1195_v24 = vsel %vm1189_vm7, %v2661_v21, %v2700_v40  ;;  %v1140_v46 = vsel %vm1135_vm8, %v2670_v37, %v2671_v54  ;;  %v4254_v21 = vld [vmem:[#allocation37_spill] sm:$0xff] }
 0x18d   : > { %1945 = vmatpush.msrb.mxu2 %v3531_v19  ;;  %2019 = vmatpush.msra.mxu0 %v1357_v10  ;;  %v1466_v10 = vsel %vm1459_vm2, %v2665_v26, %v2666_v6  ;;  %v1358_v5 = vsel %vm1351_vm4, %v2685_v18, %v2686_v47  ;;  %v4239_v26 = vld [vmem:[#allocation36_spill] sm:$0xff]  ;;  %v1196_v53 = vsel %vm1189_vm7, %v2700_v40, %v2701_v33  ;;  %v4255_v40 = vld [vmem:[#allocation33_spill] sm:$0xff] }
 0x18e   : > { %1961 = vmatpush.msra.mxu3 %v4228_v22  ;;  %1976 = vmatpush.msra.mxu1 %v1518_v11  ;;  %v3913_v32 = vpop.permute.xlu0 %2688  ;;  %v2681_v11 = vunpack.i.h.bf16 %v3884_v15  ;;  %v4240_v37 = vld [vmem:[#allocation32_spill] sm:$0xff] }
 0x18f   : > { %1990 = vmatpush.msra.mxu2 %v3480_v16  ;;  %v3925_v19 = vpop.permute.xlu1 %2693  ;;  %v2690_v16 = vunpack.i.l.bf16 %v3913_v32  ;;  %v2691_v3 = vunpack.i.h.bf16 %v3913_v32  ;;  %1886 = vmatmul.f32.vlgmr.msrb.gmra.mxu1 %v3686_v57  ;;  %v4245_v32 = vld [vmem:[#allocation20_spill] sm:$0xff] }
 0x190   : > { %1962 = vmatpush.msra.mxu3 %v4229_v56  ;;  %1977 = vmatpush.msra.mxu1 %v1464_v17  ;;  %v2695_v42 = vunpack.i.l.bf16 %v3925_v19  ;;  %v4238_v17 = vld [vmem:[#allocation40_spill] sm:$0xff]  ;;  %v2696_v4 = vunpack.i.h.bf16 %v3925_v19  ;;  %v1086_v45 = vsel %vm1081_vm9, %v2680_v7, %v2681_v11 }
 0x191   : > { %1991 = vmatpush.msra.mxu2 %v4230_v38  ;;  %v1303_v0 = vsel %vm1297_vm5, %v2641_v34, %v2690_v16  ;;  %v1304_v15 = vsel %vm1297_vm5, %v2690_v16, %v2691_v3  ;;  %v4241_v7 = vld [vmem:[#allocation28_spill] sm:$0xff]  ;;  %v4242_v34 = vld [vmem:[#allocation53_spill] sm:$0xff] }
 0x192   : > { %1963 = vmatpush.msra.mxu3 %v4231_v62  ;;  %1978 = vmatpush.msra.mxu1 %v1410_v35  ;;  %v1249_v58 = vsel %vm1243_vm6, %v2651_v43, %v2695_v42  ;;  %v1250_v60 = vsel %vm1243_vm6, %v2695_v42, %v2696_v4  ;;  %v4246_v16 = vld [vmem:[#allocation57_spill] sm:$0xff]  ;;  %v4247_v42 = vld [vmem:[#allocation16_spill] sm:$0xff] }
 0x193   : > { %1992 = vmatpush.msra.mxu2 %v4232_v29  ;;  %2020 = vmatpush.msra.mxu0 %v1303_v0  ;;  %v4248_v38 = vld [vmem:[#allocation41_spill] sm:$0xff]  ;;  %v4249_v62 = vld [vmem:[#allocation12_spill] sm:$0xff] }
 0x194   : > { %1964 = vmatpush.msra.mxu3 %v4233_v48  ;;  %1979 = vmatpush.msra.mxu1 %v1356_v50  ;;  %v4250_v35 = vld [vmem:[#allocation49_spill] sm:$0xff]  ;;  %v4259_v50 = vld [vmem:[#allocation4_spill] sm:$0xff] }
 0x195   : > { %1993 = vmatpush.msra.mxu2 %v4234_v9  ;;  %2021 = vmatpush.msra.mxu0 %v1249_v58  ;;  %v4252_v0 = vld [vmem:[#allocation45_spill] sm:$0xff] }
 0x196   : > { %1965 = vmatpush.msra.mxu3 %v4235_v27  ;;  %1980 = vmatpush.msra.mxu1 %v1302_v12  ;;  %v2704_v20 = vpop.permute.xlu0 %2703  ;;  %v4253_v43 = vld [vmem:[#allocation29_spill] sm:$0xff] }
 0x197   : > { %1994 = vmatpush.msra.mxu2 %v4236_v31  ;;  %v2709_v13 = vpop.permute.xlu1 %2708  ;;  %v2705_v28 = vunpack.i.l.bf16 %v2704_v20  ;;  %2022 = vmatpush.msra.mxu0 %v1195_v24  ;;  %v2706_v18 = vunpack.i.h.bf16 %v2704_v20  ;;  %v4256_v29 = vld [vmem:[#allocation17_spill] sm:$0xff] }
 0x198   : > { %2055 = vmatpush.msrb.mxu3 %v1574_v14  ;;  %1981 = vmatpush.msra.mxu1 %v1248_v1  ;;  %v2710_v22 = vunpack.i.l.bf16 %v2709_v13  ;;  %v2711_v63 = vunpack.i.h.bf16 %v2709_v13  ;;  %v4257_v48 = vld [vmem:[#allocation25_spill] sm:$0xff] }
 0x199   : > { %1995 = vmatpush.msra.mxu2 %v4237_v30  ;;  %v1141_v56 = vsel %vm1135_vm8, %v2671_v54, %v2705_v28  ;;  %1966 = vmatmul.f32.vlgmr.msra.gmra.mxu3 %v3686_v57  ;;  %v1142_v19 = vsel %vm1135_vm8, %v2705_v28, %v2706_v18  ;;  %v4261_v9 = vld [vmem:[#allocation9_spill] sm:$0xff] }
 0x19a   : > { %2056 = vmatpush.msrb.mxu3 %v1520_v52  ;;  %1982 = vmatpush.msra.mxu1 %v1194_v51  ;;  %v1087_v25 = vsel %vm1081_vm9, %v2681_v11, %v2710_v22  ;;  %v1088_v61 = vsel %vm1081_vm9, %v2710_v22, %v2711_v63 }
 0x19b   : > { %1996 = vmatpush.msra.mxu2 %v4238_v17  ;;  %2023 = vmatpush.msra.mxu0 %v1141_v56 }
 0x19c   : > { %2057 = vmatpush.msrb.mxu3 %v1466_v10  ;;  %1983 = vmatpush.msra.mxu1 %v1140_v46 }
 0x19d   : > { %1997 = vmatpush.msra.mxu2 %v4239_v26  ;;  %2024 = vmatpush.msra.mxu0 %v1087_v25 }
 0x19e   : > { %2058 = vmatpush.msrb.mxu3 %v1412_v49  ;;  %1984 = vmatpush.msra.mxu1 %v1086_v45 }
 0x19f   : > { %1998 = vmatpush.msra.mxu2 %v4240_v37  ;;  %2025 = vmatpush.msra.mxu0 %v3558_v36  ;;  %v4244_v36 = vld [vmem:[#allocation59_spill] sm:$0xff] }
 0x1a0   : > { %2059 = vmatpush.msrb.mxu3 %v1358_v5  ;;  %1985 = vmatpush.msra.mxu1 %v1032_v39 }
 0x1a1   : > { %1999 = vmatpush.msra.mxu2 %v4241_v7  ;;  %2151 = vmatmul.msk.f32.vlgmr.msra.gmra.mxu0 %vm1786_vm10, %v3711_v2 }
 0x1a2   : > { %2030 = vmatpush.msrb.mxu1 %v4242_v34  ;;  %2060 = vmatpush.msrb.mxu3 %v1304_v15 }
 0x1a3   : > { %2000 = vmatpush.msra.mxu2 %v4243_v23  ;;  %2150 = vmatmul.msk.f32.vlgmr.msra.gmra.mxu1 %vm1786_vm10, %v3711_v2 }
 0x1a4   : > { %2031 = vmatpush.msrb.mxu1 %v4244_v36  ;;  %2061 = vmatpush.msrb.mxu3 %v1250_v60 }
 0x1a5   : > { %2001 = vmatpush.msra.mxu2 %v4245_v32 }
 0x1a6   : > { %2032 = vmatpush.msrb.mxu1 %v4246_v16  ;;  %2062 = vmatpush.msrb.mxu3 %v1196_v53 }
 0x1a7   : > { %2002 = vmatpush.msra.mxu2 %v4247_v42 }
 0x1a8   : > { %2033 = vmatpush.msrb.mxu1 %v4248_v38  ;;  %2063 = vmatpush.msrb.mxu3 %v1142_v19 }
 0x1a9   : > { %2003 = vmatpush.msra.mxu2 %v4249_v62 }
 0x1aa   : > { %2034 = vmatpush.msrb.mxu1 %v4250_v35  ;;  %2064 = vmatpush.msrb.mxu3 %v1088_v61 }
 0x1ab   : > { %2004 = vmatpush.msra.mxu2 %v4251_v59 }
 0x1ac   : > { %2035 = vmatpush.msrb.mxu1 %v4252_v0  ;;  %2065 = vmatpush.msrb.mxu3 %v3561_v8  ;;  %v4258_v8 = vld [vmem:[#allocation21_spill] sm:$0xff] }
 0x1ad   : > { %2149 = vmatmul.msk.f32.vlgmr.msrb.gmra.mxu2 %vm1786_vm10, %v3711_v2  ;;  %2152 = vmatmul.msk.f32.vlgmr.msrb.gmra.mxu3 %vm1786_vm10, %v3711_v2  ;;  %v177_v2 = vld [vmem:[%s2783_s17 + $0x30] sm:$0xff] }
 0x1ae   : > { %2036 = vmatpush.msrb.mxu1 %v4253_v43  ;;  %2005 = vmatpush.msra.mxu2 %v176_v55 }
 0x1b0   : > { %2037 = vmatpush.msrb.mxu1 %v4254_v21 }
 0x1b2   : > { %2038 = vmatpush.msrb.mxu1 %v4255_v40 }
 0x1b4   : > { %2039 = vmatpush.msrb.mxu1 %v4256_v29 }
 0x1b5   : > { %2006 = vmatmul.f32.vlgmr.msra.gmra.mxu2 %v3686_v57 }
 0x1b6   : > { %2040 = vmatpush.msrb.mxu1 %v4257_v48 }
 0x1b8   : > { %2041 = vmatpush.msrb.mxu1 %v4258_v8 }
 0x1ba   : > { %2042 = vmatpush.msrb.mxu1 %v4259_v50 }
 0x1bc   : > { %2043 = vmatpush.msrb.mxu1 %v4260_v44 }
 0x1be   : > { %2044 = vmatpush.msrb.mxu1 %v4261_v9 }
 0x1c0   : > { %2045 = vmatpush.msrb.mxu1 %v177_v2 }
 0x1c1   : > { %2046 = vmatmul.f32.vlgmr.msrb.gmra.mxu1 %v3686_v57  ;;  %v1807_v27 = vpop.f32.mrf.mxu0 }
 0x1ca   : > { %v1847_v12 = vpop.f32.mrf.mxu2 }
 0x1d0   : > { %v1927_v56 = vpop.f32.mrf.mxu0 }
 0x1e1   : > { %v1784_v6 = vpop.permute.xlu2 %1783 }
 0x1e2   : > { %v1808_v14 = vadd.f32 %v1807_v27, %v1784_v6  ;;  %v1848_v54 = vadd.f32 %v1847_v12, %v1784_v6  ;;  %v1928_v49 = vadd.f32 %v1927_v56, %v1784_v6 }
 0x1e4   : > { %v1867_v58 = vpop.f32.mrf.mxu3 }
 0x1e5   : > { %v1868_v20 = vadd.f32 %v1867_v58, %v1848_v54 }
 0x1e7   : > { %v2071_v57 = vmax.f32 %v1868_v20, 0.0 }
 0x1e8   : > { %v1827_v41 = vpop.f32.mrf.mxu1 }
 0x1e9   : > { %v1828_v31 = vadd.f32 %v1827_v41, %v1808_v14  ;;  %2078 = vst [vmem:[%s4059_s29 + $0x8] sm:$0xff] %v2071_v57 }
 0x1eb   : > { %v2070_v1 = vmax.f32 %v1828_v31, 0.0 }
 0x1ed   : > { %2077 = vst [vmem:[%s4059_s29] sm:$0xff] %v2070_v1 }
 0x1fa   : > { %v1907_v24 = vpop.f32.mrf.mxu3 }
 0x20c   : > { %v1887_v47 = vpop.f32.mrf.mxu1 }
 0x20d   : > { %v1888_v13 = vadd.f32 %v1887_v47, %v1784_v6 }
 0x20f   : > { %v1908_v52 = vadd.f32 %v1907_v24, %v1888_v13 }
 0x211   : > { %v2072_v11 = vmax.f32 %v1908_v52, 0.0 }
 0x213   : > { %2079 = vst [vmem:[%s4059_s29 + $0x10] sm:$0xff] %v2072_v11 }
 0x21c   : > { %v1967_v28 = vpop.f32.mrf.mxu3 }
 0x21d   : > { %v1968_v22 = vadd.f32 %v1967_v28, %v1784_v6 }
 0x21e   : > { %v2027_v4 = vpop.f32.mrf.mxu0 }
 0x220   : > { %v1987_v30 = vpop.f32.mrf.mxu1 }
 0x221   : > { %v1988_v51 = vadd.f32 %v1987_v30, %v1968_v22 }
 0x223   : > { %v2074_v10 = vmax.f32 %v1988_v51, 0.0 }
 0x225   : > { %2081 = vst [vmem:[%s4059_s29 + $0x20] sm:$0xff] %v2074_v10 }
 0x230   : > { %v1947_v3 = vpop.f32.mrf.mxu2  ;;  %v2067_v37 = vpop.f32.mrf.mxu3 }
 0x231   : > { %v1948_v17 = vadd.f32 %v1947_v3, %v1928_v49 }
 0x233   : > { %v2073_v46 = vmax.f32 %v1948_v17, 0.0 }
 0x235   : > { %2080 = vst [vmem:[%s4059_s29 + $0x18] sm:$0xff] %v2073_v46 }
 0x238   : > { %v2007_v5 = vpop.f32.mrf.mxu2 }
 0x239   : > { %v2008_v26 = vadd.f32 %v2007_v5, %v1784_v6 }
 0x23b   : > { %v2028_v45 = vadd.f32 %v2027_v4, %v2008_v26 }
 0x23d   : > { %v2075_v25 = vmax.f32 %v2028_v45, 0.0 }
 0x23e   : > { %v2047_v33 = vpop.f32.mrf.mxu1 }
 0x23f   : > { %v2048_v39 = vadd.f32 %v2047_v33, %v1784_v6  ;;  %2082 = vst [vmem:[%s4059_s29 + $0x28] sm:$0xff] %v2075_v25 }
 0x241   : > { %v2068_v15 = vadd.f32 %v2067_v37, %v2048_v39 }
 0x243   : > { %v2076_v18 = vmax.f32 %v2068_v15, 0.0 }
 0x245   : > { %2083 = vst [vmem:[%s4059_s29 + $0x30] sm:$0xff] %v2076_v18 }
 0x246 PF: > { %s13_s12 = sadd.s32 1, %s2720_s12  }
 0x247   : > { %p10_p4 = scmp.ge.s32.totalorder %s13_s12, 4  }
 0x249   :  { %12 = sbr.rel (!%p10_p4) target bundleno = 1 (0x1), region = 62 }

</bundles_post_ra>
